<compile_context>
chip_gen: v6e
topology: v6e:2x2x1
jax: 0.10.0
libtpu: 0.0.40
codegen_flags: <defaults>
</compile_context>

<pallas_src>
import functools

import jax
import jax.numpy as jnp
import numpy as np
from jax.experimental import pallas as pl
from jax.experimental.pallas import tpu as pltpu

LEAKY_SLOPE = 0.2          # GATConv default negative_slope
BN_EPS = 1e-5
NEG_INF = np.float32(-1e30)


# ----------------------------------------------------------------------------
# Fused Pallas kernel: 3x (GATConv + BN + ReLU) -> attention pooling -> MLP
# ----------------------------------------------------------------------------
def fused_gnn_kernel(x_ref, adj_ref, gmask_ref, wcat_ref, vec_ref, mat_ref, out_ref,
                     *, num_layers, heads, out_dim, in_dims, mlp_dim, num_out):
    C = out_dim
    H = heads
    HC = H * C
    M = mlp_dim
    M2 = mlp_dim // 2
    G = num_out

    adj = adj_ref[...]                       # (N, N)
    gmask = gmask_ref[...]                   # (Gr, N)
    vec = vec_ref[...]                       # (2L+7, max(M,C,G))  row-vector slab
    mat = mat_ref[...]                       # (max(C,M,M2), 2M+M2+G+1) matrix slab
    h = x_ref[...]                           # (N, Fin)

    for l in range(num_layers):
        fin = in_dims[l]
        wcat = wcat_ref[l][:fin, :]          # (fin, HC+2H)  [W | W@att_dst | W@att_src]
        # ONE matmul: projection + both per-head score terms
        xpa = jnp.dot(h, wcat, preferred_element_type=jnp.float32)   # (N, HC+2H)
        xp = xpa[:, :HC]                                             # (N, H*C)
        a_dst = xpa[:, HC:HC + H]                                    # (N, H)
        a_src_t = xpa[:, HC + H:HC + 2 * H].T                        # (H, N) one small XLU xpose

        # heads=4: fully unrolled static loop.  Per-head softmax with MASKED row
        # max (robust); normalization is folded INTO p so a single fused matmul
        # accumulates all heads.
        p_cols = []
        x_rows = []
        for hd in range(H):
            e = a_dst[:, hd:hd + 1] + a_src_t[hd:hd + 1, :]           # (N, N)
            e = jnp.where(e > 0, e, LEAKY_SLOPE * e)                  # LeakyReLU(0.2)
            e = jnp.where(adj > 0, e, NEG_INF)                        # mask non-edges
            m = jnp.max(e, axis=1, keepdims=True)                     # masked row max
            p = jnp.exp(e - m)                                        # masked -> exactly 0
            s = jnp.sum(p, axis=1, keepdims=True)                     # (N, 1)
            p_cols.append(p * pl.reciprocal(s, approx=True))          # normalized p
            x_rows.append(xp[:, hd * C:(hd + 1) * C])                 # (N, C)
        p_cat = jnp.concatenate(p_cols, axis=1)                       # (N, H*N)
        x_stack = jnp.concatenate(x_rows, axis=0)                     # (H*N, C)
        acc = jnp.dot(p_cat, x_stack, preferred_element_type=jnp.float32)  # 1 MXU push

        # head-mean + GAT bias + eval-BN + ReLU folded into one FMA + max
        scale = vec[2 * l:2 * l + 1, :C]
        shift = vec[2 * l + 1:2 * l + 2, :C]
        h = jnp.maximum(acc * scale + shift, 0.0)

    # ----- unpack epilogue parameters from the packed slabs -----
    aw1 = mat[:C, 0:M]
    pw1 = mat[:C, M:2 * M]
    pw2 = mat[:M, 2 * M:2 * M + M2]
    pw3 = mat[:M2, 2 * M + M2:2 * M + M2 + G]
    aw2 = mat[:M, 2 * M + M2 + G:2 * M + M2 + G + 1]

    r = 2 * num_layers
    ab1 = vec[r:r + 1, :M]
    ab2 = vec[r + 1:r + 2, 0:1]
    ps1 = vec[r + 2:r + 3, :M]
    pt1 = vec[r + 3:r + 4, :M]
    ps2 = vec[r + 4:r + 5, :M2]
    pt2 = vec[r + 5:r + 6, :M2]
    pb3 = vec[r + 6:r + 7, :G]

    # ----- AttentionAggregator: per-graph softmax pooling (per-graph masked max) -----
    t = jnp.tanh(jnp.dot(h, aw1, preferred_element_type=jnp.float32) + ab1)   # (N, M)
    sc = jnp.dot(t, aw2, preferred_element_type=jnp.float32) + ab2            # (N, 1)
    eg = jnp.where(gmask > 0, sc.T, NEG_INF)                                  # (Gr, N)
    mg = jnp.max(eg, axis=1, keepdims=True)                                   # per-graph max
    pg = jnp.exp(eg - mg)                                                     # masked -> 0
    num = jnp.dot(pg, h, preferred_element_type=jnp.float32)                  # (Gr, C)
    den = jnp.sum(pg, axis=1, keepdims=True)                                  # (Gr, 1)
    ge = num * pl.reciprocal(den, approx=True)                                # (Gr, C)

    # ----- predictor MLP (Linear biases folded into BN shift) -----
    h1 = jnp.maximum(jnp.dot(ge, pw1, preferred_element_type=jnp.float32) * ps1 + pt1, 0.0)
    h2 = jnp.maximum(jnp.dot(h1, pw2, preferred_element_type=jnp.float32) * ps2 + pt2, 0.0)
    out_ref[...] = jnp.dot(h2, pw3, preferred_element_type=jnp.float32) + pb3


# ----------------------------------------------------------------------------
# Host-side operand preparation: fold attention through W, pack 6 operands
# ----------------------------------------------------------------------------
def _block_diag_att(att):
    """(H, C) per-head attention vector -> (H*C, H) block-diagonal matrix."""
    H, C = att.shape
    m = jnp.zeros((H * C, H), jnp.float32)
    for h in range(H):
        m = m.at[h * C:(h + 1) * C, h].set(att[h])
    return m


def build_fused_operands(x, adj, gmask, params):
    heads = params["heads"]
    C = params["gnn_hidden_dim"]
    in_dims = [int(p["w"].shape[0]) for p in params["gnn"]]
    fmax = max(in_dims)

    # --- projection slab (L, Fmax, H*C + 2H): [ W | W@bd(att_dst) | W@bd(att_src) ]
    wcats = []
    for p in params["gnn"]:
        w = p["w"]
        fin = int(w.shape[0])
        w_att = jnp.concatenate([w @ _block_diag_att(p["att_dst"]),
                                 w @ _block_diag_att(p["att_src"])], axis=1)
        wcat = jnp.concatenate([w, w_att], axis=1)
        wcats.append(jnp.pad(wcat, ((0, fmax - fin), (0, 0))))
    wcat_all = jnp.stack(wcats).astype(jnp.float32)

    a = params["attn_agg"]
    q = params["predictor"]
    M = int(a["w1"].shape[1])
    M2 = int(q["w2"].shape[1])
    G_out = int(q["w3"].shape[1])

    # --- row-vector slab: per-layer (scale, shift), then epilogue biases/affines
    Wv = max(M, C, G_out)

    def row(v):
        v = jnp.ravel(jnp.asarray(v, jnp.float32))
        return jnp.pad(v, (0, Wv - v.shape[0])).reshape(1, Wv)

    rows = []
    for p in params["gnn"]:
        rows.append(row(p["bn_scale"] / float(heads)))                 # folds head-mean
        rows.append(row(p["bias"] * p["bn_scale"] + p["bn_shift"]))    # folds GAT bias
    rows += [row(a["b1"]), row(a["b2"]),
             row(q["s1"]), row(q["b1"] * q["s1"] + q["t1"]),
             row(q["s2"]), row(q["b2"] * q["s2"] + q["t2"]),
             row(q["b3"])]
    vec_slab = jnp.concatenate(rows, axis=0)

    # --- epilogue matrix slab: row-padded, column-concatenated
    Rm = max(C, M, M2)

    def pad_rows(m):
        m = jnp.asarray(m, jnp.float32)
        return jnp.pad(m, ((0, Rm - m.shape[0]), (0, 0)))

    mat_slab = jnp.concatenate([pad_rows(a["w1"]), pad_rows(q["w1"]),
                                pad_rows(q["w2"]), pad_rows(q["w3"]),
                                pad_rows(a["w2"])], axis=1)

    return [x, adj, gmask, wcat_all, vec_slab, mat_slab]


def improved_spatial_gnn_forward(x, adj, gmask, params):
    heads = params["heads"]
    C = params["gnn_hidden_dim"]
    L = len(params["gnn"])
    in_dims = tuple(int(p["w"].shape[0]) for p in params["gnn"])
    M = int(params["attn_agg"]["w1"].shape[1])
    G_out = int(params["predictor"]["w3"].shape[1])
    num_graphs = gmask.shape[0]

    operands = build_fused_operands(x, adj, gmask, params)
    kern = functools.partial(fused_gnn_kernel,
                             num_layers=L, heads=heads, out_dim=C,
                             in_dims=in_dims, mlp_dim=M, num_out=G_out)
    return pl.pallas_call(
        kern,
        out_shape=jax.ShapeDtypeStruct((num_graphs, G_out), jnp.float32),
        in_specs=[pl.BlockSpec(memory_space=pltpu.MemorySpace.VMEM)] * len(operands),
        out_specs=pl.BlockSpec(memory_space=pltpu.MemorySpace.VMEM),
    )(*operands)


# ----------------------------------------------------------------------------
# Parameter construction (deterministic, synthetic) + pure-JAX reference
# ----------------------------------------------------------------------------
def fold_bn(gamma, beta, rmean, rvar, eps=BN_EPS):
    scale = gamma / jnp.sqrt(rvar + eps)
    shift = beta - rmean * scale
    return scale.reshape(1, -1), shift.reshape(1, -1)


def init_params(key, node_feature_dim, gnn_hidden_dim, num_layers, heads,
                mlp_hidden_dim, num_global_nodes):
    params = {"heads": heads, "gnn_hidden_dim": gnn_hidden_dim,
              "num_global_nodes": num_global_nodes, "gnn": []}
    in_dim = node_feature_dim
    for _ in range(num_layers):
        key, *ks = jax.random.split(key, 8)
        gamma = 1.0 + 0.1 * jax.random.normal(ks[4], (gnn_hidden_dim,), jnp.float32)
        beta = 0.1 * jax.random.normal(ks[5], (gnn_hidden_dim,), jnp.float32)
        rmean = 0.1 * jax.random.normal(ks[6], (gnn_hidden_dim,), jnp.float32)
        rvar = jnp.ones((gnn_hidden_dim,), jnp.float32)
        scale, shift = fold_bn(gamma, beta, rmean, rvar)
        params["gnn"].append(dict(
            w=jax.random.normal(ks[0], (in_dim, heads * gnn_hidden_dim),
                                jnp.float32) / np.sqrt(in_dim),
            att_src=0.1 * jax.random.normal(ks[1], (heads, gnn_hidden_dim), jnp.float32),
            att_dst=0.1 * jax.random.normal(ks[2], (heads, gnn_hidden_dim), jnp.float32),
            bias=0.1 * jax.random.normal(ks[3], (1, gnn_hidden_dim), jnp.float32),
            bn_scale=scale, bn_shift=shift))
        in_dim = gnn_hidden_dim

    key, k1, k2, k3, k4 = jax.random.split(key, 5)
    params["attn_agg"] = dict(
        w1=jax.random.normal(k1, (gnn_hidden_dim, mlp_hidden_dim),
                             jnp.float32) / np.sqrt(gnn_hidden_dim),
        b1=0.1 * jax.random.normal(k2, (1, mlp_hidden_dim), jnp.float32),
        w2=jax.random.normal(k3, (mlp_hidden_dim, 1),
                             jnp.float32) / np.sqrt(mlp_hidden_dim),
        b2=0.1 * jax.random.normal(k4, (1, 1), jnp.float32))

    m2 = mlp_hidden_dim // 2
    key, *ks = jax.random.split(key, 11)
    s1, t1 = fold_bn(1.0 + 0.1 * jax.random.normal(ks[3], (mlp_hidden_dim,), jnp.float32),
                     0.1 * jax.random.normal(ks[4], (mlp_hidden_dim,), jnp.float32),
                     jnp.zeros((mlp_hidden_dim,), jnp.float32),
                     jnp.ones((mlp_hidden_dim,), jnp.float32))
    s2, t2 = fold_bn(1.0 + 0.1 * jax.random.normal(ks[5], (m2,), jnp.float32),
                     0.1 * jax.random.normal(ks[6], (m2,), jnp.float32),
                     jnp.zeros((m2,), jnp.float32),
                     jnp.ones((m2,), jnp.float32))
    params["predictor"] = dict(
        w1=jax.random.normal(ks[0], (gnn_hidden_dim, mlp_hidden_dim),
                             jnp.float32) / np.sqrt(gnn_hidden_dim),
        b1=0.1 * jax.random.normal(ks[1], (1, mlp_hidden_dim), jnp.float32),
        s1=s1, t1=t1,
        w2=jax.random.normal(ks[2], (mlp_hidden_dim, m2),
                             jnp.float32) / np.sqrt(mlp_hidden_dim),
        b2=0.1 * jax.random.normal(ks[7], (1, m2), jnp.float32),
        s2=s2, t2=t2,
        w3=jax.random.normal(ks[8], (m2, num_global_nodes),
                             jnp.float32) / np.sqrt(m2),
        b3=0.1 * jax.random.normal(ks[9], (1, num_global_nodes), jnp.float32))
    return params


def reference_forward(x, adj, gmask, params):
    """Pure-jnp reference implementing the same (eval-mode) math."""
    heads, out_dim = params["heads"], params["gnn_hidden_dim"]
    h = x
    for p in params["gnn"]:
        xp = h @ p["w"]
        acc = jnp.zeros((h.shape[0], out_dim), jnp.float32)
        for hd in range(heads):
            xh = xp[:, hd * out_dim:(hd + 1) * out_dim]
            a_src = jnp.sum(xh * p["att_src"][hd:hd + 1], axis=1, keepdims=True)
            a_dst = jnp.sum(xh * p["att_dst"][hd:hd + 1], axis=1, keepdims=True)
            e = a_dst + a_src.T
            e = jnp.where(e > 0, e, LEAKY_SLOPE * e)
            e = jnp.where(adj > 0, e, NEG_INF)
            pmat = jnp.exp(e - jnp.max(e, axis=1, keepdims=True)) * adj
            alpha = pmat / jnp.sum(pmat, axis=1, keepdims=True)
            acc = acc + alpha @ xh
        out = acc / heads + p["bias"]
        h = jnp.maximum(out * p["bn_scale"] + p["bn_shift"], 0.0)
    a = params["attn_agg"]
    scores = jnp.tanh(h @ a["w1"] + a["b1"]) @ a["w2"] + a["b2"]
    e = jnp.where(gmask > 0, scores.T, NEG_INF)
    pmat = jnp.exp(e - jnp.max(e, axis=1, keepdims=True)) * gmask
    w = pmat / jnp.sum(pmat, axis=1, keepdims=True)
    ge = w @ h
    q = params["predictor"]
    h1 = jnp.maximum((ge @ q["w1"] + q["b1"]) * q["s1"] + q["t1"], 0.0)
    h2 = jnp.maximum((h1 @ q["w2"] + q["b2"]) * q["s2"] + q["t2"], 0.0)
    return h2 @ q["w3"] + q["b3"]


# ----------------------------------------------------------------------------
# Example
# ----------------------------------------------------------------------------
if __name__ == "__main__":
    NUM_GLOBAL_NODES = 10
    NODE_FEATURE_DIM = 8
    GNN_HIDDEN_DIM = 32
    NUM_GNN_LAYERS = 3
    GAT_HEADS = 4
    MLP_HIDDEN_DIM = 64
    NODES_PER_GRAPH = 8
    NUM_GRAPHS = 2
    N = NODES_PER_GRAPH * NUM_GRAPHS      # 16 nodes total

    key = jax.random.PRNGKey(0)
    key, kx = jax.random.split(key)
    x = jax.random.normal(kx, (N, NODE_FEATURE_DIM), jnp.float32)

    # deterministic edge_index (2, E): each node -> (i+1) and (i+3) within its graph
    src, dst = [], []
    for g in range(NUM_GRAPHS):
        base = g * NODES_PER_GRAPH
        for i in range(NODES_PER_GRAPH):
            for off in (1, 3):
                src.append(base + i)
                dst.append(base + (i + off) % NODES_PER_GRAPH)
    edge_index = np.stack([np.array(src), np.array(dst)])          # (2, 32)
    batch_idx = np.repeat(np.arange(NUM_GRAPHS), NODES_PER_GRAPH)   # (16,)

    # dense adjacency (dst-major) + self loops; per-graph one-hot membership mask
    adj = np.zeros((N, N), np.float32)
    adj[edge_index[1], edge_index[0]] = 1.0
    adj += np.eye(N, dtype=np.float32)                              # add_self_loops=True
    adj = jnp.asarray(adj)
    gmask = jnp.asarray((batch_idx[None, :] ==
                         np.arange(NUM_GRAPHS)[:, None]).astype(np.float32))

    params = init_params(key, NODE_FEATURE_DIM, GNN_HIDDEN_DIM, NUM_GNN_LAYERS,
                         GAT_HEADS, MLP_HIDDEN_DIM, NUM_GLOBAL_NODES)

    logits = improved_spatial_gnn_forward(x, adj, gmask, params)
    logits = jax.block_until_ready(logits)
    assert logits.shape == (NUM_GRAPHS, NUM_GLOBAL_NODES)

    ref = jax.block_until_ready(reference_forward(x, adj, gmask, params))
    # tolerance accounts for the approximate EUP reciprocals in the softmax paths
    np.testing.assert_allclose(np.asarray(logits), np.asarray(ref),
                               rtol=5e-3, atol=5e-3)
    print("KERNEL_OK")
</pallas_src>

<mosaic_0001>
module attributes {stable_mosaic.version = 11 : i64} {
  func.func @fused_gnn_kernel(%arg0: memref<16x8xf32, #tpu.memory_space<vmem>>, %arg1: memref<16x16xf32, #tpu.memory_space<vmem>>, %arg2: memref<2x16xf32, #tpu.memory_space<vmem>>, %arg3: memref<3x32x136xf32, #tpu.memory_space<vmem>>, %arg4: memref<13x64xf32, #tpu.memory_space<vmem>>, %arg5: memref<64x171xf32, #tpu.memory_space<vmem>>, %arg6: memref<2x10xf32, #tpu.memory_space<vmem>>) attributes {dimension_semantics = [], scalar_prefetch = 0 : i64, scratch_operands = 0 : i64, tpu.core_type = #tpu.core_type<tc>} {
    %c0 = arith.constant 0 : index
    %c0_0 = arith.constant 0 : index
    %0 = vector.load %arg1[%c0, %c0_0] : memref<16x16xf32, #tpu.memory_space<vmem>>, vector<16x16xf32>
    %c0_1 = arith.constant 0 : index
    %c0_2 = arith.constant 0 : index
    %1 = vector.load %arg2[%c0_1, %c0_2] : memref<2x16xf32, #tpu.memory_space<vmem>>, vector<2x16xf32>
    %c0_3 = arith.constant 0 : index
    %c0_4 = arith.constant 0 : index
    %2 = vector.load %arg4[%c0_3, %c0_4] : memref<13x64xf32, #tpu.memory_space<vmem>>, vector<13x64xf32>
    %c0_5 = arith.constant 0 : index
    %c0_6 = arith.constant 0 : index
    %3 = vector.load %arg5[%c0_5, %c0_6] : memref<64x171xf32, #tpu.memory_space<vmem>>, vector<64x171xf32>
    %c0_7 = arith.constant 0 : index
    %c0_8 = arith.constant 0 : index
    %4 = vector.load %arg0[%c0_7, %c0_8] : memref<16x8xf32, #tpu.memory_space<vmem>>, vector<16x8xf32>
    %c0_9 = arith.constant 0 : index
    %c0_10 = arith.constant 0 : index
    %c0_11 = arith.constant 0 : index
    %5 = vector.load %arg3[%c0_9, %c0_10, %c0_11] : memref<3x32x136xf32, #tpu.memory_space<vmem>>, vector<1x32x136xf32>
    %6 = vector.shape_cast %5 : vector<1x32x136xf32> to vector<32x136xf32>
    %7 = vector.extract_strided_slice %6 {offsets = [0, 0], sizes = [8, 136], strides = [1, 1]} : vector<32x136xf32> to vector<8x136xf32>
    %cst = arith.constant dense<0.000000e+00> : vector<16x136xf32>
    %8 = tpu.matmul %4, %7, %cst {dimension_numbers = #tpu.dot_dimension_numbers<[1], [0], [0], [1], [0, 0, 1, 1], [], []>} : vector<16x8xf32>, vector<8x136xf32>, vector<16x136xf32> -> vector<16x136xf32>
    %9 = vector.extract_strided_slice %8 {offsets = [0, 0], sizes = [16, 128], strides = [1, 1]} : vector<16x136xf32> to vector<16x128xf32>
    %10 = vector.extract_strided_slice %8 {offsets = [0, 128], sizes = [16, 4], strides = [1, 1]} : vector<16x136xf32> to vector<16x4xf32>
    %11 = vector.extract_strided_slice %8 {offsets = [0, 132], sizes = [16, 4], strides = [1, 1]} : vector<16x136xf32> to vector<16x4xf32>
    %12 = tpu.transpose %11, [1, 0] : vector<16x4xf32> -> vector<4x16xf32>
    %13 = vector.extract_strided_slice %10 {offsets = [0, 0], sizes = [16, 1], strides = [1, 1]} : vector<16x4xf32> to vector<16x1xf32>
    %14 = vector.extract_strided_slice %12 {offsets = [0, 0], sizes = [1, 16], strides = [1, 1]} : vector<4x16xf32> to vector<1x16xf32>
    %15 = vector.broadcast %13 : vector<16x1xf32> to vector<16x16xf32>
    %16 = vector.broadcast %14 : vector<1x16xf32> to vector<16x16xf32>
    %17 = arith.addf %15, %16 : vector<16x16xf32>
    %cst_12 = arith.constant 0.000000e+00 : f32
    %18 = vector.broadcast %cst_12 : f32 to vector<16x16xf32>
    %19 = arith.cmpf ogt, %17, %18 : vector<16x16xf32>
    %cst_13 = arith.constant 2.000000e-01 : f32
    %20 = vector.broadcast %cst_13 : f32 to vector<16x16xf32>
    %21 = arith.mulf %20, %17 : vector<16x16xf32>
    %22 = arith.select %19, %17, %21 : vector<16x16xi1>, vector<16x16xf32>
    %cst_14 = arith.constant 0.000000e+00 : f32
    %23 = vector.broadcast %cst_14 : f32 to vector<16x16xf32>
    %24 = arith.cmpf ogt, %0, %23 : vector<16x16xf32>
    %cst_15 = arith.constant -1.000000e+30 : f32
    %25 = vector.broadcast %cst_15 : f32 to vector<16x16xf32>
    %26 = arith.select %24, %22, %25 : vector<16x16xi1>, vector<16x16xf32>
    %cst_16 = arith.constant dense<0xFF800000> : vector<16xf32>
    %27 = vector.multi_reduction <maximumf>, %26, %cst_16 [1] : vector<16x16xf32> to vector<16xf32>
    %28 = vector.shape_cast %27 : vector<16xf32> to vector<16x1xf32>
    %29 = vector.broadcast %28 : vector<16x1xf32> to vector<16x16xf32>
    %30 = arith.subf %26, %29 : vector<16x16xf32>
    %31 = math.exp %30 : vector<16x16xf32>
    %cst_17 = arith.constant dense<0.000000e+00> : vector<16xf32>
    %32 = vector.multi_reduction <add>, %31, %cst_17 [1] : vector<16x16xf32> to vector<16xf32>
    %33 = vector.shape_cast %32 : vector<16xf32> to vector<16x1xf32>
    %34 = tpu.reciprocal %33 {approx = true} : vector<16x1xf32> -> vector<16x1xf32>
    %35 = vector.broadcast %34 : vector<16x1xf32> to vector<16x16xf32>
    %36 = arith.mulf %31, %35 : vector<16x16xf32>
    %37 = vector.extract_strided_slice %9 {offsets = [0, 0], sizes = [16, 32], strides = [1, 1]} : vector<16x128xf32> to vector<16x32xf32>
    %38 = vector.extract_strided_slice %10 {offsets = [0, 1], sizes = [16, 1], strides = [1, 1]} : vector<16x4xf32> to vector<16x1xf32>
    %39 = vector.extract_strided_slice %12 {offsets = [1, 0], sizes = [1, 16], strides = [1, 1]} : vector<4x16xf32> to vector<1x16xf32>
    %40 = vector.broadcast %38 : vector<16x1xf32> to vector<16x16xf32>
    %41 = vector.broadcast %39 : vector<1x16xf32> to vector<16x16xf32>
    %42 = arith.addf %40, %41 : vector<16x16xf32>
    %cst_18 = arith.constant 0.000000e+00 : f32
    %43 = vector.broadcast %cst_18 : f32 to vector<16x16xf32>
    %44 = arith.cmpf ogt, %42, %43 : vector<16x16xf32>
    %cst_19 = arith.constant 2.000000e-01 : f32
    %45 = vector.broadcast %cst_19 : f32 to vector<16x16xf32>
    %46 = arith.mulf %45, %42 : vector<16x16xf32>
    %47 = arith.select %44, %42, %46 : vector<16x16xi1>, vector<16x16xf32>
    %cst_20 = arith.constant 0.000000e+00 : f32
    %48 = vector.broadcast %cst_20 : f32 to vector<16x16xf32>
    %49 = arith.cmpf ogt, %0, %48 : vector<16x16xf32>
    %cst_21 = arith.constant -1.000000e+30 : f32
    %50 = vector.broadcast %cst_21 : f32 to vector<16x16xf32>
    %51 = arith.select %49, %47, %50 : vector<16x16xi1>, vector<16x16xf32>
    %cst_22 = arith.constant dense<0xFF800000> : vector<16xf32>
    %52 = vector.multi_reduction <maximumf>, %51, %cst_22 [1] : vector<16x16xf32> to vector<16xf32>
    %53 = vector.shape_cast %52 : vector<16xf32> to vector<16x1xf32>
    %54 = vector.broadcast %53 : vector<16x1xf32> to vector<16x16xf32>
    %55 = arith.subf %51, %54 : vector<16x16xf32>
    %56 = math.exp %55 : vector<16x16xf32>
    %cst_23 = arith.constant dense<0.000000e+00> : vector<16xf32>
    %57 = vector.multi_reduction <add>, %56, %cst_23 [1] : vector<16x16xf32> to vector<16xf32>
    %58 = vector.shape_cast %57 : vector<16xf32> to vector<16x1xf32>
    %59 = tpu.reciprocal %58 {approx = true} : vector<16x1xf32> -> vector<16x1xf32>
    %60 = vector.broadcast %59 : vector<16x1xf32> to vector<16x16xf32>
    %61 = arith.mulf %56, %60 : vector<16x16xf32>
    %62 = vector.extract_strided_slice %9 {offsets = [0, 32], sizes = [16, 32], strides = [1, 1]} : vector<16x128xf32> to vector<16x32xf32>
    %63 = vector.extract_strided_slice %10 {offsets = [0, 2], sizes = [16, 1], strides = [1, 1]} : vector<16x4xf32> to vector<16x1xf32>
    %64 = vector.extract_strided_slice %12 {offsets = [2, 0], sizes = [1, 16], strides = [1, 1]} : vector<4x16xf32> to vector<1x16xf32>
    %65 = vector.broadcast %63 : vector<16x1xf32> to vector<16x16xf32>
    %66 = vector.broadcast %64 : vector<1x16xf32> to vector<16x16xf32>
    %67 = arith.addf %65, %66 : vector<16x16xf32>
    %cst_24 = arith.constant 0.000000e+00 : f32
    %68 = vector.broadcast %cst_24 : f32 to vector<16x16xf32>
    %69 = arith.cmpf ogt, %67, %68 : vector<16x16xf32>
    %cst_25 = arith.constant 2.000000e-01 : f32
    %70 = vector.broadcast %cst_25 : f32 to vector<16x16xf32>
    %71 = arith.mulf %70, %67 : vector<16x16xf32>
    %72 = arith.select %69, %67, %71 : vector<16x16xi1>, vector<16x16xf32>
    %cst_26 = arith.constant 0.000000e+00 : f32
    %73 = vector.broadcast %cst_26 : f32 to vector<16x16xf32>
    %74 = arith.cmpf ogt, %0, %73 : vector<16x16xf32>
    %cst_27 = arith.constant -1.000000e+30 : f32
    %75 = vector.broadcast %cst_27 : f32 to vector<16x16xf32>
    %76 = arith.select %74, %72, %75 : vector<16x16xi1>, vector<16x16xf32>
    %cst_28 = arith.constant dense<0xFF800000> : vector<16xf32>
    %77 = vector.multi_reduction <maximumf>, %76, %cst_28 [1] : vector<16x16xf32> to vector<16xf32>
    %78 = vector.shape_cast %77 : vector<16xf32> to vector<16x1xf32>
    %79 = vector.broadcast %78 : vector<16x1xf32> to vector<16x16xf32>
    %80 = arith.subf %76, %79 : vector<16x16xf32>
    %81 = math.exp %80 : vector<16x16xf32>
    %cst_29 = arith.constant dense<0.000000e+00> : vector<16xf32>
    %82 = vector.multi_reduction <add>, %81, %cst_29 [1] : vector<16x16xf32> to vector<16xf32>
    %83 = vector.shape_cast %82 : vector<16xf32> to vector<16x1xf32>
    %84 = tpu.reciprocal %83 {approx = true} : vector<16x1xf32> -> vector<16x1xf32>
    %85 = vector.broadcast %84 : vector<16x1xf32> to vector<16x16xf32>
    %86 = arith.mulf %81, %85 : vector<16x16xf32>
    %87 = vector.extract_strided_slice %9 {offsets = [0, 64], sizes = [16, 32], strides = [1, 1]} : vector<16x128xf32> to vector<16x32xf32>
    %88 = vector.extract_strided_slice %10 {offsets = [0, 3], sizes = [16, 1], strides = [1, 1]} : vector<16x4xf32> to vector<16x1xf32>
    %89 = vector.extract_strided_slice %12 {offsets = [3, 0], sizes = [1, 16], strides = [1, 1]} : vector<4x16xf32> to vector<1x16xf32>
    %90 = vector.broadcast %88 : vector<16x1xf32> to vector<16x16xf32>
    %91 = vector.broadcast %89 : vector<1x16xf32> to vector<16x16xf32>
    %92 = arith.addf %90, %91 : vector<16x16xf32>
    %cst_30 = arith.constant 0.000000e+00 : f32
    %93 = vector.broadcast %cst_30 : f32 to vector<16x16xf32>
    %94 = arith.cmpf ogt, %92, %93 : vector<16x16xf32>
    %cst_31 = arith.constant 2.000000e-01 : f32
    %95 = vector.broadcast %cst_31 : f32 to vector<16x16xf32>
    %96 = arith.mulf %95, %92 : vector<16x16xf32>
    %97 = arith.select %94, %92, %96 : vector<16x16xi1>, vector<16x16xf32>
    %cst_32 = arith.constant 0.000000e+00 : f32
    %98 = vector.broadcast %cst_32 : f32 to vector<16x16xf32>
    %99 = arith.cmpf ogt, %0, %98 : vector<16x16xf32>
    %cst_33 = arith.constant -1.000000e+30 : f32
    %100 = vector.broadcast %cst_33 : f32 to vector<16x16xf32>
    %101 = arith.select %99, %97, %100 : vector<16x16xi1>, vector<16x16xf32>
    %cst_34 = arith.constant dense<0xFF800000> : vector<16xf32>
    %102 = vector.multi_reduction <maximumf>, %101, %cst_34 [1] : vector<16x16xf32> to vector<16xf32>
    %103 = vector.shape_cast %102 : vector<16xf32> to vector<16x1xf32>
    %104 = vector.broadcast %103 : vector<16x1xf32> to vector<16x16xf32>
    %105 = arith.subf %101, %104 : vector<16x16xf32>
    %106 = math.exp %105 : vector<16x16xf32>
    %cst_35 = arith.constant dense<0.000000e+00> : vector<16xf32>
    %107 = vector.multi_reduction <add>, %106, %cst_35 [1] : vector<16x16xf32> to vector<16xf32>
    %108 = vector.shape_cast %107 : vector<16xf32> to vector<16x1xf32>
    %109 = tpu.reciprocal %108 {approx = true} : vector<16x1xf32> -> vector<16x1xf32>
    %110 = vector.broadcast %109 : vector<16x1xf32> to vector<16x16xf32>
    %111 = arith.mulf %106, %110 : vector<16x16xf32>
    %112 = vector.extract_strided_slice %9 {offsets = [0, 96], sizes = [16, 32], strides = [1, 1]} : vector<16x128xf32> to vector<16x32xf32>
    %113 = tpu.concatenate %36, %61, %86, %111 in 1 : vector<16x16xf32>, vector<16x16xf32>, vector<16x16xf32>, vector<16x16xf32> -> vector<16x64xf32>
    %114 = tpu.concatenate %37, %62, %87, %112 in 0 : vector<16x32xf32>, vector<16x32xf32>, vector<16x32xf32>, vector<16x32xf32> -> vector<64x32xf32>
    %cst_36 = arith.constant dense<0.000000e+00> : vector<16x32xf32>
    %115 = tpu.matmul %113, %114, %cst_36 {dimension_numbers = #tpu.dot_dimension_numbers<[1], [0], [0], [1], [0, 0, 1, 1], [], []>} : vector<16x64xf32>, vector<64x32xf32>, vector<16x32xf32> -> vector<16x32xf32>
    %116 = vector.extract_strided_slice %2 {offsets = [0, 0], sizes = [1, 32], strides = [1, 1]} : vector<13x64xf32> to vector<1x32xf32>
    %117 = vector.extract_strided_slice %2 {offsets = [1, 0], sizes = [1, 32], strides = [1, 1]} : vector<13x64xf32> to vector<1x32xf32>
    %118 = vector.broadcast %116 : vector<1x32xf32> to vector<16x32xf32>
    %119 = arith.mulf %115, %118 : vector<16x32xf32>
    %120 = vector.broadcast %117 : vector<1x32xf32> to vector<16x32xf32>
    %121 = arith.addf %119, %120 : vector<16x32xf32>
    %cst_37 = arith.constant 0.000000e+00 : f32
    %122 = vector.broadcast %cst_37 : f32 to vector<16x32xf32>
    %123 = arith.maximumf %121, %122 : vector<16x32xf32>
    %c1 = arith.constant 1 : index
    %c0_38 = arith.constant 0 : index
    %c0_39 = arith.constant 0 : index
    %124 = vector.load %arg3[%c1, %c0_38, %c0_39] : memref<3x32x136xf32, #tpu.memory_space<vmem>>, vector<1x32x136xf32>
    %125 = vector.shape_cast %124 : vector<1x32x136xf32> to vector<32x136xf32>
    %cst_40 = arith.constant dense<0.000000e+00> : vector<16x136xf32>
    %126 = tpu.matmul %123, %125, %cst_40 {dimension_numbers = #tpu.dot_dimension_numbers<[1], [0], [0], [1], [0, 0, 1, 1], [], []>} : vector<16x32xf32>, vector<32x136xf32>, vector<16x136xf32> -> vector<16x136xf32>
    %127 = vector.extract_strided_slice %126 {offsets = [0, 0], sizes = [16, 128], strides = [1, 1]} : vector<16x136xf32> to vector<16x128xf32>
    %128 = vector.extract_strided_slice %126 {offsets = [0, 128], sizes = [16, 4], strides = [1, 1]} : vector<16x136xf32> to vector<16x4xf32>
    %129 = vector.extract_strided_slice %126 {offsets = [0, 132], sizes = [16, 4], strides = [1, 1]} : vector<16x136xf32> to vector<16x4xf32>
    %130 = tpu.transpose %129, [1, 0] : vector<16x4xf32> -> vector<4x16xf32>
    %131 = vector.extract_strided_slice %128 {offsets = [0, 0], sizes = [16, 1], strides = [1, 1]} : vector<16x4xf32> to vector<16x1xf32>
    %132 = vector.extract_strided_slice %130 {offsets = [0, 0], sizes = [1, 16], strides = [1, 1]} : vector<4x16xf32> to vector<1x16xf32>
    %133 = vector.broadcast %131 : vector<16x1xf32> to vector<16x16xf32>
    %134 = vector.broadcast %132 : vector<1x16xf32> to vector<16x16xf32>
    %135 = arith.addf %133, %134 : vector<16x16xf32>
    %cst_41 = arith.constant 0.000000e+00 : f32
    %136 = vector.broadcast %cst_41 : f32 to vector<16x16xf32>
    %137 = arith.cmpf ogt, %135, %136 : vector<16x16xf32>
    %cst_42 = arith.constant 2.000000e-01 : f32
    %138 = vector.broadcast %cst_42 : f32 to vector<16x16xf32>
    %139 = arith.mulf %138, %135 : vector<16x16xf32>
    %140 = arith.select %137, %135, %139 : vector<16x16xi1>, vector<16x16xf32>
    %cst_43 = arith.constant 0.000000e+00 : f32
    %141 = vector.broadcast %cst_43 : f32 to vector<16x16xf32>
    %142 = arith.cmpf ogt, %0, %141 : vector<16x16xf32>
    %cst_44 = arith.constant -1.000000e+30 : f32
    %143 = vector.broadcast %cst_44 : f32 to vector<16x16xf32>
    %144 = arith.select %142, %140, %143 : vector<16x16xi1>, vector<16x16xf32>
    %cst_45 = arith.constant dense<0xFF800000> : vector<16xf32>
    %145 = vector.multi_reduction <maximumf>, %144, %cst_45 [1] : vector<16x16xf32> to vector<16xf32>
    %146 = vector.shape_cast %145 : vector<16xf32> to vector<16x1xf32>
    %147 = vector.broadcast %146 : vector<16x1xf32> to vector<16x16xf32>
    %148 = arith.subf %144, %147 : vector<16x16xf32>
    %149 = math.exp %148 : vector<16x16xf32>
    %cst_46 = arith.constant dense<0.000000e+00> : vector<16xf32>
    %150 = vector.multi_reduction <add>, %149, %cst_46 [1] : vector<16x16xf32> to vector<16xf32>
    %151 = vector.shape_cast %150 : vector<16xf32> to vector<16x1xf32>
    %152 = tpu.reciprocal %151 {approx = true} : vector<16x1xf32> -> vector<16x1xf32>
    %153 = vector.broadcast %152 : vector<16x1xf32> to vector<16x16xf32>
    %154 = arith.mulf %149, %153 : vector<16x16xf32>
    %155 = vector.extract_strided_slice %127 {offsets = [0, 0], sizes = [16, 32], strides = [1, 1]} : vector<16x128xf32> to vector<16x32xf32>
    %156 = vector.extract_strided_slice %128 {offsets = [0, 1], sizes = [16, 1], strides = [1, 1]} : vector<16x4xf32> to vector<16x1xf32>
    %157 = vector.extract_strided_slice %130 {offsets = [1, 0], sizes = [1, 16], strides = [1, 1]} : vector<4x16xf32> to vector<1x16xf32>
    %158 = vector.broadcast %156 : vector<16x1xf32> to vector<16x16xf32>
    %159 = vector.broadcast %157 : vector<1x16xf32> to vector<16x16xf32>
    %160 = arith.addf %158, %159 : vector<16x16xf32>
    %cst_47 = arith.constant 0.000000e+00 : f32
    %161 = vector.broadcast %cst_47 : f32 to vector<16x16xf32>
    %162 = arith.cmpf ogt, %160, %161 : vector<16x16xf32>
    %cst_48 = arith.constant 2.000000e-01 : f32
    %163 = vector.broadcast %cst_48 : f32 to vector<16x16xf32>
    %164 = arith.mulf %163, %160 : vector<16x16xf32>
    %165 = arith.select %162, %160, %164 : vector<16x16xi1>, vector<16x16xf32>
    %cst_49 = arith.constant 0.000000e+00 : f32
    %166 = vector.broadcast %cst_49 : f32 to vector<16x16xf32>
    %167 = arith.cmpf ogt, %0, %166 : vector<16x16xf32>
    %cst_50 = arith.constant -1.000000e+30 : f32
    %168 = vector.broadcast %cst_50 : f32 to vector<16x16xf32>
    %169 = arith.select %167, %165, %168 : vector<16x16xi1>, vector<16x16xf32>
    %cst_51 = arith.constant dense<0xFF800000> : vector<16xf32>
    %170 = vector.multi_reduction <maximumf>, %169, %cst_51 [1] : vector<16x16xf32> to vector<16xf32>
    %171 = vector.shape_cast %170 : vector<16xf32> to vector<16x1xf32>
    %172 = vector.broadcast %171 : vector<16x1xf32> to vector<16x16xf32>
    %173 = arith.subf %169, %172 : vector<16x16xf32>
    %174 = math.exp %173 : vector<16x16xf32>
    %cst_52 = arith.constant dense<0.000000e+00> : vector<16xf32>
    %175 = vector.multi_reduction <add>, %174, %cst_52 [1] : vector<16x16xf32> to vector<16xf32>
    %176 = vector.shape_cast %175 : vector<16xf32> to vector<16x1xf32>
    %177 = tpu.reciprocal %176 {approx = true} : vector<16x1xf32> -> vector<16x1xf32>
    %178 = vector.broadcast %177 : vector<16x1xf32> to vector<16x16xf32>
    %179 = arith.mulf %174, %178 : vector<16x16xf32>
    %180 = vector.extract_strided_slice %127 {offsets = [0, 32], sizes = [16, 32], strides = [1, 1]} : vector<16x128xf32> to vector<16x32xf32>
    %181 = vector.extract_strided_slice %128 {offsets = [0, 2], sizes = [16, 1], strides = [1, 1]} : vector<16x4xf32> to vector<16x1xf32>
    %182 = vector.extract_strided_slice %130 {offsets = [2, 0], sizes = [1, 16], strides = [1, 1]} : vector<4x16xf32> to vector<1x16xf32>
    %183 = vector.broadcast %181 : vector<16x1xf32> to vector<16x16xf32>
    %184 = vector.broadcast %182 : vector<1x16xf32> to vector<16x16xf32>
    %185 = arith.addf %183, %184 : vector<16x16xf32>
    %cst_53 = arith.constant 0.000000e+00 : f32
    %186 = vector.broadcast %cst_53 : f32 to vector<16x16xf32>
    %187 = arith.cmpf ogt, %185, %186 : vector<16x16xf32>
    %cst_54 = arith.constant 2.000000e-01 : f32
    %188 = vector.broadcast %cst_54 : f32 to vector<16x16xf32>
    %189 = arith.mulf %188, %185 : vector<16x16xf32>
    %190 = arith.select %187, %185, %189 : vector<16x16xi1>, vector<16x16xf32>
    %cst_55 = arith.constant 0.000000e+00 : f32
    %191 = vector.broadcast %cst_55 : f32 to vector<16x16xf32>
    %192 = arith.cmpf ogt, %0, %191 : vector<16x16xf32>
    %cst_56 = arith.constant -1.000000e+30 : f32
    %193 = vector.broadcast %cst_56 : f32 to vector<16x16xf32>
    %194 = arith.select %192, %190, %193 : vector<16x16xi1>, vector<16x16xf32>
    %cst_57 = arith.constant dense<0xFF800000> : vector<16xf32>
    %195 = vector.multi_reduction <maximumf>, %194, %cst_57 [1] : vector<16x16xf32> to vector<16xf32>
    %196 = vector.shape_cast %195 : vector<16xf32> to vector<16x1xf32>
    %197 = vector.broadcast %196 : vector<16x1xf32> to vector<16x16xf32>
    %198 = arith.subf %194, %197 : vector<16x16xf32>
    %199 = math.exp %198 : vector<16x16xf32>
    %cst_58 = arith.constant dense<0.000000e+00> : vector<16xf32>
    %200 = vector.multi_reduction <add>, %199, %cst_58 [1] : vector<16x16xf32> to vector<16xf32>
    %201 = vector.shape_cast %200 : vector<16xf32> to vector<16x1xf32>
    %202 = tpu.reciprocal %201 {approx = true} : vector<16x1xf32> -> vector<16x1xf32>
    %203 = vector.broadcast %202 : vector<16x1xf32> to vector<16x16xf32>
    %204 = arith.mulf %199, %203 : vector<16x16xf32>
    %205 = vector.extract_strided_slice %127 {offsets = [0, 64], sizes = [16, 32], strides = [1, 1]} : vector<16x128xf32> to vector<16x32xf32>
    %206 = vector.extract_strided_slice %128 {offsets = [0, 3], sizes = [16, 1], strides = [1, 1]} : vector<16x4xf32> to vector<16x1xf32>
    %207 = vector.extract_strided_slice %130 {offsets = [3, 0], sizes = [1, 16], strides = [1, 1]} : vector<4x16xf32> to vector<1x16xf32>
    %208 = vector.broadcast %206 : vector<16x1xf32> to vector<16x16xf32>
    %209 = vector.broadcast %207 : vector<1x16xf32> to vector<16x16xf32>
    %210 = arith.addf %208, %209 : vector<16x16xf32>
    %cst_59 = arith.constant 0.000000e+00 : f32
    %211 = vector.broadcast %cst_59 : f32 to vector<16x16xf32>
    %212 = arith.cmpf ogt, %210, %211 : vector<16x16xf32>
    %cst_60 = arith.constant 2.000000e-01 : f32
    %213 = vector.broadcast %cst_60 : f32 to vector<16x16xf32>
    %214 = arith.mulf %213, %210 : vector<16x16xf32>
    %215 = arith.select %212, %210, %214 : vector<16x16xi1>, vector<16x16xf32>
    %cst_61 = arith.constant 0.000000e+00 : f32
    %216 = vector.broadcast %cst_61 : f32 to vector<16x16xf32>
    %217 = arith.cmpf ogt, %0, %216 : vector<16x16xf32>
    %cst_62 = arith.constant -1.000000e+30 : f32
    %218 = vector.broadcast %cst_62 : f32 to vector<16x16xf32>
    %219 = arith.select %217, %215, %218 : vector<16x16xi1>, vector<16x16xf32>
    %cst_63 = arith.constant dense<0xFF800000> : vector<16xf32>
    %220 = vector.multi_reduction <maximumf>, %219, %cst_63 [1] : vector<16x16xf32> to vector<16xf32>
    %221 = vector.shape_cast %220 : vector<16xf32> to vector<16x1xf32>
    %222 = vector.broadcast %221 : vector<16x1xf32> to vector<16x16xf32>
    %223 = arith.subf %219, %222 : vector<16x16xf32>
    %224 = math.exp %223 : vector<16x16xf32>
    %cst_64 = arith.constant dense<0.000000e+00> : vector<16xf32>
    %225 = vector.multi_reduction <add>, %224, %cst_64 [1] : vector<16x16xf32> to vector<16xf32>
    %226 = vector.shape_cast %225 : vector<16xf32> to vector<16x1xf32>
    %227 = tpu.reciprocal %226 {approx = true} : vector<16x1xf32> -> vector<16x1xf32>
    %228 = vector.broadcast %227 : vector<16x1xf32> to vector<16x16xf32>
    %229 = arith.mulf %224, %228 : vector<16x16xf32>
    %230 = vector.extract_strided_slice %127 {offsets = [0, 96], sizes = [16, 32], strides = [1, 1]} : vector<16x128xf32> to vector<16x32xf32>
    %231 = tpu.concatenate %154, %179, %204, %229 in 1 : vector<16x16xf32>, vector<16x16xf32>, vector<16x16xf32>, vector<16x16xf32> -> vector<16x64xf32>
    %232 = tpu.concatenate %155, %180, %205, %230 in 0 : vector<16x32xf32>, vector<16x32xf32>, vector<16x32xf32>, vector<16x32xf32> -> vector<64x32xf32>
    %cst_65 = arith.constant dense<0.000000e+00> : vector<16x32xf32>
    %233 = tpu.matmul %231, %232, %cst_65 {dimension_numbers = #tpu.dot_dimension_numbers<[1], [0], [0], [1], [0, 0, 1, 1], [], []>} : vector<16x64xf32>, vector<64x32xf32>, vector<16x32xf32> -> vector<16x32xf32>
    %234 = vector.extract_strided_slice %2 {offsets = [2, 0], sizes = [1, 32], strides = [1, 1]} : vector<13x64xf32> to vector<1x32xf32>
    %235 = vector.extract_strided_slice %2 {offsets = [3, 0], sizes = [1, 32], strides = [1, 1]} : vector<13x64xf32> to vector<1x32xf32>
    %236 = vector.broadcast %234 : vector<1x32xf32> to vector<16x32xf32>
    %237 = arith.mulf %233, %236 : vector<16x32xf32>
    %238 = vector.broadcast %235 : vector<1x32xf32> to vector<16x32xf32>
    %239 = arith.addf %237, %238 : vector<16x32xf32>
    %cst_66 = arith.constant 0.000000e+00 : f32
    %240 = vector.broadcast %cst_66 : f32 to vector<16x32xf32>
    %241 = arith.maximumf %239, %240 : vector<16x32xf32>
    %c2 = arith.constant 2 : index
    %c0_67 = arith.constant 0 : index
    %c0_68 = arith.constant 0 : index
    %242 = vector.load %arg3[%c2, %c0_67, %c0_68] : memref<3x32x136xf32, #tpu.memory_space<vmem>>, vector<1x32x136xf32>
    %243 = vector.shape_cast %242 : vector<1x32x136xf32> to vector<32x136xf32>
    %cst_69 = arith.constant dense<0.000000e+00> : vector<16x136xf32>
    %244 = tpu.matmul %241, %243, %cst_69 {dimension_numbers = #tpu.dot_dimension_numbers<[1], [0], [0], [1], [0, 0, 1, 1], [], []>} : vector<16x32xf32>, vector<32x136xf32>, vector<16x136xf32> -> vector<16x136xf32>
    %245 = vector.extract_strided_slice %244 {offsets = [0, 0], sizes = [16, 128], strides = [1, 1]} : vector<16x136xf32> to vector<16x128xf32>
    %246 = vector.extract_strided_slice %244 {offsets = [0, 128], sizes = [16, 4], strides = [1, 1]} : vector<16x136xf32> to vector<16x4xf32>
    %247 = vector.extract_strided_slice %244 {offsets = [0, 132], sizes = [16, 4], strides = [1, 1]} : vector<16x136xf32> to vector<16x4xf32>
    %248 = tpu.transpose %247, [1, 0] : vector<16x4xf32> -> vector<4x16xf32>
    %249 = vector.extract_strided_slice %246 {offsets = [0, 0], sizes = [16, 1], strides = [1, 1]} : vector<16x4xf32> to vector<16x1xf32>
    %250 = vector.extract_strided_slice %248 {offsets = [0, 0], sizes = [1, 16], strides = [1, 1]} : vector<4x16xf32> to vector<1x16xf32>
    %251 = vector.broadcast %249 : vector<16x1xf32> to vector<16x16xf32>
    %252 = vector.broadcast %250 : vector<1x16xf32> to vector<16x16xf32>
    %253 = arith.addf %251, %252 : vector<16x16xf32>
    %cst_70 = arith.constant 0.000000e+00 : f32
    %254 = vector.broadcast %cst_70 : f32 to vector<16x16xf32>
    %255 = arith.cmpf ogt, %253, %254 : vector<16x16xf32>
    %cst_71 = arith.constant 2.000000e-01 : f32
    %256 = vector.broadcast %cst_71 : f32 to vector<16x16xf32>
    %257 = arith.mulf %256, %253 : vector<16x16xf32>
    %258 = arith.select %255, %253, %257 : vector<16x16xi1>, vector<16x16xf32>
    %cst_72 = arith.constant 0.000000e+00 : f32
    %259 = vector.broadcast %cst_72 : f32 to vector<16x16xf32>
    %260 = arith.cmpf ogt, %0, %259 : vector<16x16xf32>
    %cst_73 = arith.constant -1.000000e+30 : f32
    %261 = vector.broadcast %cst_73 : f32 to vector<16x16xf32>
    %262 = arith.select %260, %258, %261 : vector<16x16xi1>, vector<16x16xf32>
    %cst_74 = arith.constant dense<0xFF800000> : vector<16xf32>
    %263 = vector.multi_reduction <maximumf>, %262, %cst_74 [1] : vector<16x16xf32> to vector<16xf32>
    %264 = vector.shape_cast %263 : vector<16xf32> to vector<16x1xf32>
    %265 = vector.broadcast %264 : vector<16x1xf32> to vector<16x16xf32>
    %266 = arith.subf %262, %265 : vector<16x16xf32>
    %267 = math.exp %266 : vector<16x16xf32>
    %cst_75 = arith.constant dense<0.000000e+00> : vector<16xf32>
    %268 = vector.multi_reduction <add>, %267, %cst_75 [1] : vector<16x16xf32> to vector<16xf32>
    %269 = vector.shape_cast %268 : vector<16xf32> to vector<16x1xf32>
    %270 = tpu.reciprocal %269 {approx = true} : vector<16x1xf32> -> vector<16x1xf32>
    %271 = vector.broadcast %270 : vector<16x1xf32> to vector<16x16xf32>
    %272 = arith.mulf %267, %271 : vector<16x16xf32>
    %273 = vector.extract_strided_slice %245 {offsets = [0, 0], sizes = [16, 32], strides = [1, 1]} : vector<16x128xf32> to vector<16x32xf32>
    %274 = vector.extract_strided_slice %246 {offsets = [0, 1], sizes = [16, 1], strides = [1, 1]} : vector<16x4xf32> to vector<16x1xf32>
    %275 = vector.extract_strided_slice %248 {offsets = [1, 0], sizes = [1, 16], strides = [1, 1]} : vector<4x16xf32> to vector<1x16xf32>
    %276 = vector.broadcast %274 : vector<16x1xf32> to vector<16x16xf32>
    %277 = vector.broadcast %275 : vector<1x16xf32> to vector<16x16xf32>
    %278 = arith.addf %276, %277 : vector<16x16xf32>
    %cst_76 = arith.constant 0.000000e+00 : f32
    %279 = vector.broadcast %cst_76 : f32 to vector<16x16xf32>
    %280 = arith.cmpf ogt, %278, %279 : vector<16x16xf32>
    %cst_77 = arith.constant 2.000000e-01 : f32
    %281 = vector.broadcast %cst_77 : f32 to vector<16x16xf32>
    %282 = arith.mulf %281, %278 : vector<16x16xf32>
    %283 = arith.select %280, %278, %282 : vector<16x16xi1>, vector<16x16xf32>
    %cst_78 = arith.constant 0.000000e+00 : f32
    %284 = vector.broadcast %cst_78 : f32 to vector<16x16xf32>
    %285 = arith.cmpf ogt, %0, %284 : vector<16x16xf32>
    %cst_79 = arith.constant -1.000000e+30 : f32
    %286 = vector.broadcast %cst_79 : f32 to vector<16x16xf32>
    %287 = arith.select %285, %283, %286 : vector<16x16xi1>, vector<16x16xf32>
    %cst_80 = arith.constant dense<0xFF800000> : vector<16xf32>
    %288 = vector.multi_reduction <maximumf>, %287, %cst_80 [1] : vector<16x16xf32> to vector<16xf32>
    %289 = vector.shape_cast %288 : vector<16xf32> to vector<16x1xf32>
    %290 = vector.broadcast %289 : vector<16x1xf32> to vector<16x16xf32>
    %291 = arith.subf %287, %290 : vector<16x16xf32>
    %292 = math.exp %291 : vector<16x16xf32>
    %cst_81 = arith.constant dense<0.000000e+00> : vector<16xf32>
    %293 = vector.multi_reduction <add>, %292, %cst_81 [1] : vector<16x16xf32> to vector<16xf32>
    %294 = vector.shape_cast %293 : vector<16xf32> to vector<16x1xf32>
    %295 = tpu.reciprocal %294 {approx = true} : vector<16x1xf32> -> vector<16x1xf32>
    %296 = vector.broadcast %295 : vector<16x1xf32> to vector<16x16xf32>
    %297 = arith.mulf %292, %296 : vector<16x16xf32>
    %298 = vector.extract_strided_slice %245 {offsets = [0, 32], sizes = [16, 32], strides = [1, 1]} : vector<16x128xf32> to vector<16x32xf32>
    %299 = vector.extract_strided_slice %246 {offsets = [0, 2], sizes = [16, 1], strides = [1, 1]} : vector<16x4xf32> to vector<16x1xf32>
    %300 = vector.extract_strided_slice %248 {offsets = [2, 0], sizes = [1, 16], strides = [1, 1]} : vector<4x16xf32> to vector<1x16xf32>
    %301 = vector.broadcast %299 : vector<16x1xf32> to vector<16x16xf32>
    %302 = vector.broadcast %300 : vector<1x16xf32> to vector<16x16xf32>
    %303 = arith.addf %301, %302 : vector<16x16xf32>
    %cst_82 = arith.constant 0.000000e+00 : f32
    %304 = vector.broadcast %cst_82 : f32 to vector<16x16xf32>
    %305 = arith.cmpf ogt, %303, %304 : vector<16x16xf32>
    %cst_83 = arith.constant 2.000000e-01 : f32
    %306 = vector.broadcast %cst_83 : f32 to vector<16x16xf32>
    %307 = arith.mulf %306, %303 : vector<16x16xf32>
    %308 = arith.select %305, %303, %307 : vector<16x16xi1>, vector<16x16xf32>
    %cst_84 = arith.constant 0.000000e+00 : f32
    %309 = vector.broadcast %cst_84 : f32 to vector<16x16xf32>
    %310 = arith.cmpf ogt, %0, %309 : vector<16x16xf32>
    %cst_85 = arith.constant -1.000000e+30 : f32
    %311 = vector.broadcast %cst_85 : f32 to vector<16x16xf32>
    %312 = arith.select %310, %308, %311 : vector<16x16xi1>, vector<16x16xf32>
    %cst_86 = arith.constant dense<0xFF800000> : vector<16xf32>
    %313 = vector.multi_reduction <maximumf>, %312, %cst_86 [1] : vector<16x16xf32> to vector<16xf32>
    %314 = vector.shape_cast %313 : vector<16xf32> to vector<16x1xf32>
    %315 = vector.broadcast %314 : vector<16x1xf32> to vector<16x16xf32>
    %316 = arith.subf %312, %315 : vector<16x16xf32>
    %317 = math.exp %316 : vector<16x16xf32>
    %cst_87 = arith.constant dense<0.000000e+00> : vector<16xf32>
    %318 = vector.multi_reduction <add>, %317, %cst_87 [1] : vector<16x16xf32> to vector<16xf32>
    %319 = vector.shape_cast %318 : vector<16xf32> to vector<16x1xf32>
    %320 = tpu.reciprocal %319 {approx = true} : vector<16x1xf32> -> vector<16x1xf32>
    %321 = vector.broadcast %320 : vector<16x1xf32> to vector<16x16xf32>
    %322 = arith.mulf %317, %321 : vector<16x16xf32>
    %323 = vector.extract_strided_slice %245 {offsets = [0, 64], sizes = [16, 32], strides = [1, 1]} : vector<16x128xf32> to vector<16x32xf32>
    %324 = vector.extract_strided_slice %246 {offsets = [0, 3], sizes = [16, 1], strides = [1, 1]} : vector<16x4xf32> to vector<16x1xf32>
    %325 = vector.extract_strided_slice %248 {offsets = [3, 0], sizes = [1, 16], strides = [1, 1]} : vector<4x16xf32> to vector<1x16xf32>
    %326 = vector.broadcast %324 : vector<16x1xf32> to vector<16x16xf32>
    %327 = vector.broadcast %325 : vector<1x16xf32> to vector<16x16xf32>
    %328 = arith.addf %326, %327 : vector<16x16xf32>
    %cst_88 = arith.constant 0.000000e+00 : f32
    %329 = vector.broadcast %cst_88 : f32 to vector<16x16xf32>
    %330 = arith.cmpf ogt, %328, %329 : vector<16x16xf32>
    %cst_89 = arith.constant 2.000000e-01 : f32
    %331 = vector.broadcast %cst_89 : f32 to vector<16x16xf32>
    %332 = arith.mulf %331, %328 : vector<16x16xf32>
    %333 = arith.select %330, %328, %332 : vector<16x16xi1>, vector<16x16xf32>
    %cst_90 = arith.constant 0.000000e+00 : f32
    %334 = vector.broadcast %cst_90 : f32 to vector<16x16xf32>
    %335 = arith.cmpf ogt, %0, %334 : vector<16x16xf32>
    %cst_91 = arith.constant -1.000000e+30 : f32
    %336 = vector.broadcast %cst_91 : f32 to vector<16x16xf32>
    %337 = arith.select %335, %333, %336 : vector<16x16xi1>, vector<16x16xf32>
    %cst_92 = arith.constant dense<0xFF800000> : vector<16xf32>
    %338 = vector.multi_reduction <maximumf>, %337, %cst_92 [1] : vector<16x16xf32> to vector<16xf32>
    %339 = vector.shape_cast %338 : vector<16xf32> to vector<16x1xf32>
    %340 = vector.broadcast %339 : vector<16x1xf32> to vector<16x16xf32>
    %341 = arith.subf %337, %340 : vector<16x16xf32>
    %342 = math.exp %341 : vector<16x16xf32>
    %cst_93 = arith.constant dense<0.000000e+00> : vector<16xf32>
    %343 = vector.multi_reduction <add>, %342, %cst_93 [1] : vector<16x16xf32> to vector<16xf32>
    %344 = vector.shape_cast %343 : vector<16xf32> to vector<16x1xf32>
    %345 = tpu.reciprocal %344 {approx = true} : vector<16x1xf32> -> vector<16x1xf32>
    %346 = vector.broadcast %345 : vector<16x1xf32> to vector<16x16xf32>
    %347 = arith.mulf %342, %346 : vector<16x16xf32>
    %348 = vector.extract_strided_slice %245 {offsets = [0, 96], sizes = [16, 32], strides = [1, 1]} : vector<16x128xf32> to vector<16x32xf32>
    %349 = tpu.concatenate %272, %297, %322, %347 in 1 : vector<16x16xf32>, vector<16x16xf32>, vector<16x16xf32>, vector<16x16xf32> -> vector<16x64xf32>
    %350 = tpu.concatenate %273, %298, %323, %348 in 0 : vector<16x32xf32>, vector<16x32xf32>, vector<16x32xf32>, vector<16x32xf32> -> vector<64x32xf32>
    %cst_94 = arith.constant dense<0.000000e+00> : vector<16x32xf32>
    %351 = tpu.matmul %349, %350, %cst_94 {dimension_numbers = #tpu.dot_dimension_numbers<[1], [0], [0], [1], [0, 0, 1, 1], [], []>} : vector<16x64xf32>, vector<64x32xf32>, vector<16x32xf32> -> vector<16x32xf32>
    %352 = vector.extract_strided_slice %2 {offsets = [4, 0], sizes = [1, 32], strides = [1, 1]} : vector<13x64xf32> to vector<1x32xf32>
    %353 = vector.extract_strided_slice %2 {offsets = [5, 0], sizes = [1, 32], strides = [1, 1]} : vector<13x64xf32> to vector<1x32xf32>
    %354 = vector.broadcast %352 : vector<1x32xf32> to vector<16x32xf32>
    %355 = arith.mulf %351, %354 : vector<16x32xf32>
    %356 = vector.broadcast %353 : vector<1x32xf32> to vector<16x32xf32>
    %357 = arith.addf %355, %356 : vector<16x32xf32>
    %cst_95 = arith.constant 0.000000e+00 : f32
    %358 = vector.broadcast %cst_95 : f32 to vector<16x32xf32>
    %359 = arith.maximumf %357, %358 : vector<16x32xf32>
    %360 = vector.extract_strided_slice %3 {offsets = [0, 0], sizes = [32, 64], strides = [1, 1]} : vector<64x171xf32> to vector<32x64xf32>
    %361 = vector.extract_strided_slice %3 {offsets = [0, 64], sizes = [32, 64], strides = [1, 1]} : vector<64x171xf32> to vector<32x64xf32>
    %362 = vector.extract_strided_slice %3 {offsets = [0, 128], sizes = [64, 32], strides = [1, 1]} : vector<64x171xf32> to vector<64x32xf32>
    %363 = vector.extract_strided_slice %3 {offsets = [0, 160], sizes = [32, 10], strides = [1, 1]} : vector<64x171xf32> to vector<32x10xf32>
    %364 = vector.extract_strided_slice %3 {offsets = [0, 170], sizes = [64, 1], strides = [1, 1]} : vector<64x171xf32> to vector<64x1xf32>
    %365 = vector.extract_strided_slice %2 {offsets = [6, 0], sizes = [1, 64], strides = [1, 1]} : vector<13x64xf32> to vector<1x64xf32>
    %366 = vector.extract_strided_slice %2 {offsets = [7, 0], sizes = [1, 1], strides = [1, 1]} : vector<13x64xf32> to vector<1x1xf32>
    %367 = vector.extract_strided_slice %2 {offsets = [8, 0], sizes = [1, 64], strides = [1, 1]} : vector<13x64xf32> to vector<1x64xf32>
    %368 = vector.extract_strided_slice %2 {offsets = [9, 0], sizes = [1, 64], strides = [1, 1]} : vector<13x64xf32> to vector<1x64xf32>
    %369 = vector.extract_strided_slice %2 {offsets = [10, 0], sizes = [1, 32], strides = [1, 1]} : vector<13x64xf32> to vector<1x32xf32>
    %370 = vector.extract_strided_slice %2 {offsets = [11, 0], sizes = [1, 32], strides = [1, 1]} : vector<13x64xf32> to vector<1x32xf32>
    %371 = vector.extract_strided_slice %2 {offsets = [12, 0], sizes = [1, 10], strides = [1, 1]} : vector<13x64xf32> to vector<1x10xf32>
    %cst_96 = arith.constant dense<0.000000e+00> : vector<16x64xf32>
    %372 = tpu.matmul %359, %360, %cst_96 {dimension_numbers = #tpu.dot_dimension_numbers<[1], [0], [0], [1], [0, 0, 1, 1], [], []>} : vector<16x32xf32>, vector<32x64xf32>, vector<16x64xf32> -> vector<16x64xf32>
    %373 = vector.broadcast %365 : vector<1x64xf32> to vector<16x64xf32>
    %374 = arith.addf %372, %373 : vector<16x64xf32>
    %375 = math.tanh %374 : vector<16x64xf32>
    %cst_97 = arith.constant dense<0.000000e+00> : vector<16x1xf32>
    %376 = tpu.matmul %375, %364, %cst_97 {dimension_numbers = #tpu.dot_dimension_numbers<[1], [0], [0], [1], [0, 0, 1, 1], [], []>} : vector<16x64xf32>, vector<64x1xf32>, vector<16x1xf32> -> vector<16x1xf32>
    %377 = vector.broadcast %366 : vector<1x1xf32> to vector<16x1xf32>
    %378 = arith.addf %376, %377 : vector<16x1xf32>
    %cst_98 = arith.constant 0.000000e+00 : f32
    %379 = vector.broadcast %cst_98 : f32 to vector<2x16xf32>
    %380 = arith.cmpf ogt, %1, %379 : vector<2x16xf32>
    %381 = tpu.transpose %378, [1, 0] : vector<16x1xf32> -> vector<1x16xf32>
    %cst_99 = arith.constant -1.000000e+30 : f32
    %382 = vector.shape_cast %381 : vector<1x16xf32> to vector<1x16xf32>
    %383 = vector.broadcast %382 : vector<1x16xf32> to vector<2x16xf32>
    %384 = vector.broadcast %cst_99 : f32 to vector<2x16xf32>
    %385 = arith.select %380, %383, %384 : vector<2x16xi1>, vector<2x16xf32>
    %cst_100 = arith.constant dense<0xFF800000> : vector<2xf32>
    %386 = vector.multi_reduction <maximumf>, %385, %cst_100 [1] : vector<2x16xf32> to vector<2xf32>
    %387 = vector.shape_cast %386 : vector<2xf32> to vector<2x1xf32>
    %388 = vector.broadcast %387 : vector<2x1xf32> to vector<2x16xf32>
    %389 = arith.subf %385, %388 : vector<2x16xf32>
    %390 = math.exp %389 : vector<2x16xf32>
    %cst_101 = arith.constant dense<0.000000e+00> : vector<2x32xf32>
    %391 = tpu.matmul %390, %359, %cst_101 {dimension_numbers = #tpu.dot_dimension_numbers<[1], [0], [0], [1], [0, 0, 1, 1], [], []>} : vector<2x16xf32>, vector<16x32xf32>, vector<2x32xf32> -> vector<2x32xf32>
    %cst_102 = arith.constant dense<0.000000e+00> : vector<2xf32>
    %392 = vector.multi_reduction <add>, %390, %cst_102 [1] : vector<2x16xf32> to vector<2xf32>
    %393 = vector.shape_cast %392 : vector<2xf32> to vector<2x1xf32>
    %394 = tpu.reciprocal %393 {approx = true} : vector<2x1xf32> -> vector<2x1xf32>
    %395 = vector.broadcast %394 : vector<2x1xf32> to vector<2x32xf32>
    %396 = arith.mulf %391, %395 : vector<2x32xf32>
    %cst_103 = arith.constant dense<0.000000e+00> : vector<2x64xf32>
    %397 = tpu.matmul %396, %361, %cst_103 {dimension_numbers = #tpu.dot_dimension_numbers<[1], [0], [0], [1], [0, 0, 1, 1], [], []>} : vector<2x32xf32>, vector<32x64xf32>, vector<2x64xf32> -> vector<2x64xf32>
    %398 = vector.broadcast %367 : vector<1x64xf32> to vector<2x64xf32>
    %399 = arith.mulf %397, %398 : vector<2x64xf32>
    %400 = vector.broadcast %368 : vector<1x64xf32> to vector<2x64xf32>
    %401 = arith.addf %399, %400 : vector<2x64xf32>
    %cst_104 = arith.constant 0.000000e+00 : f32
    %402 = vector.broadcast %cst_104 : f32 to vector<2x64xf32>
    %403 = arith.maximumf %401, %402 : vector<2x64xf32>
    %cst_105 = arith.constant dense<0.000000e+00> : vector<2x32xf32>
    %404 = tpu.matmul %403, %362, %cst_105 {dimension_numbers = #tpu.dot_dimension_numbers<[1], [0], [0], [1], [0, 0, 1, 1], [], []>} : vector<2x64xf32>, vector<64x32xf32>, vector<2x32xf32> -> vector<2x32xf32>
    %405 = vector.broadcast %369 : vector<1x32xf32> to vector<2x32xf32>
    %406 = arith.mulf %404, %405 : vector<2x32xf32>
    %407 = vector.broadcast %370 : vector<1x32xf32> to vector<2x32xf32>
    %408 = arith.addf %406, %407 : vector<2x32xf32>
    %cst_106 = arith.constant 0.000000e+00 : f32
    %409 = vector.broadcast %cst_106 : f32 to vector<2x32xf32>
    %410 = arith.maximumf %408, %409 : vector<2x32xf32>
    %cst_107 = arith.constant dense<0.000000e+00> : vector<2x10xf32>
    %411 = tpu.matmul %410, %363, %cst_107 {dimension_numbers = #tpu.dot_dimension_numbers<[1], [0], [0], [1], [0, 0, 1, 1], [], []>} : vector<2x32xf32>, vector<32x10xf32>, vector<2x10xf32> -> vector<2x10xf32>
    %412 = vector.broadcast %371 : vector<1x10xf32> to vector<2x10xf32>
    %413 = arith.addf %411, %412 : vector<2x10xf32>
    %c0_108 = arith.constant 0 : index
    %c0_109 = arith.constant 0 : index
    %414 = vector.load %arg6[%c0_108, %c0_109] : memref<2x10xf32, #tpu.memory_space<vmem>>, vector<2x10xf32>
    tpu.vector_store %arg6[%c0_108, %c0_109], %413 {strides = array<i32>} : memref<2x10xf32, #tpu.memory_space<vmem>>, vector<2x10xf32>,
    return
  }
}

</mosaic_0001>

<bundles_post_ra>
// kernel: tpu_custom_call.1
= control target key start
LH: loop header
LB: loop body
LE: loop exit
PB: predicated region body
PF: predicated region fallthrough
CT: control target
= control target key end

     0   :  { %11 = vsyncpa [#allocation3], 0  ;;  %s3032_s0 = inlined_call_operand.vmem [shape: f32[16,8], index: 0, kind: input, shape index: {}]   ;;  %s3033_s1 = inlined_call_operand.vmem [shape: f32[16,16], index: 1, kind: input, shape index: {}]   ;;  %s3034_s2 = inlined_call_operand.vmem [shape: f32[2,16], index: 2, kind: input, shape index: {}]   ;;  %s3035_s3 = inlined_call_operand.hbm [shape: f32[3,32,136], index: 3, kind: input, shape index: {}]   ;;  %s3036_s4 = inlined_call_operand.hbm [shape: f32[13,64], index: 4, kind: input, shape index: {}]   ;;  %s3037_s5 = inlined_call_operand.hbm [shape: f32[64,171], index: 5, kind: input, shape index: {}]   ;;  %s3038_s6 = inlined_call_operand.hbm [shape: f32[2,10], index: 6, kind: output, shape index: {}]  }
   0x1   :  { %12 = vsyncpa [#allocation6], 0 }
   0x2   :  { %13 = vsyncpa [#allocation4], 0  ;;  %s2516_s21 = smov [#allocation5]  }
   0x3   :  { %s37_s22 = sshll.u32 %s2516_s21, 4  ;;  %s38_s22 = int_to_ptr.vmem [resolvable:$true] %s37_s22 }
   0x4   :  { %s2438_s23 = scalar_lea.vmem %s38_s22, 256  ;;  %p2443_p1 = scmp.lt.s32.totalorder %s38_s22, %s38_s22 }
   0x5   :  { %p2439_p0 = scmp.ne.s32.totalorder %s38_s22, %s2438_s23  ;;  %p2444_p2 = scmp.lt.s32.totalorder %s2438_s23, %s2438_s23 }
   0x7   :  { %p2445_p3 = por %p2444_p2, %p2443_p1 }
   0x9   :  { %p2446_p4 = pnand %p2445_p3, %p2439_p0 }
   0xb   :  { %2449 = shalt.err (!%p2446_p4)
}
   0xc   :  { %s2517_s24 = smov 128   ;;  %s2518_s25 = smov 8  }
   0xd   :  { %43 = dma.hbm_to_vmem [thread:$0]  %s3036_s4, 256, %s38_s22, [#allocation6], %s2517_s24, %s2517_s24, %s2518_s25  }
   0xe   :  { %s2519_s28 = smov [#allocation2]  }
   0xf   :  { %s25_s29 = sshll.u32 %s2519_s28, 4  ;;  %s26_s29 = int_to_ptr.vmem [resolvable:$true] %s25_s29 }
  0x10   :  { %s2458_s30 = scalar_lea.vmem %s26_s29, 3072  ;;  %p2463_p6 = scmp.lt.s32.totalorder %s26_s29, %s26_s29 }
  0x11   :  { %p2459_p5 = scmp.ne.s32.totalorder %s26_s29, %s2458_s30  ;;  %p2464_p7 = scmp.lt.s32.totalorder %s2458_s30, %s2458_s30 }
  0x13   :  { %p2465_p8 = por %p2464_p7, %p2463_p6 }
  0x15   :  { %p2466_p9 = pnand %p2465_p8, %p2459_p5 }
  0x17   :  { %2469 = shalt.err (!%p2466_p9)
}
  0x18   :  { %s2520_s7 = smov 256   ;;  %s2521_s8 = smov 16  }
  0x19   :  { %31 = dma.hbm_to_vmem [thread:$0]  %s3035_s3, 3072, %s26_s29, [#allocation3], %s2520_s7, %s2520_s7, %s2521_s8  }
  0x1a   :  { %s2522_s11 = smov [#allocation7]  }
  0x1b   :  { %s49_s12 = sshll.u32 %s2522_s11, 4  ;;  %s50_s12 = int_to_ptr.vmem [resolvable:$true] %s49_s12 }
  0x1c   :  { %s2478_s4 = scalar_lea.vmem %s50_s12, 2048  ;;  %p2483_p11 = scmp.lt.s32.totalorder %s50_s12, %s50_s12 }
  0x1d   :  { %p2479_p10 = scmp.ne.s32.totalorder %s50_s12, %s2478_s4  ;;  %p2484_p12 = scmp.lt.s32.totalorder %s2478_s4, %s2478_s4 }
  0x1f   :  { %p2485_p13 = por %p2484_p12, %p2483_p11 }
  0x21   :  { %p2486_p0 = pnand %p2485_p13, %p2479_p10 }
  0x23   :  { %2489 = shalt.err (!%p2486_p0)
}
  0x24   :  { %55 = dma.hbm_to_vmem [thread:$0]  %s3037_s5, 2048, %s50_s12, [#allocation6], %s2520_s7, %s2520_s7, %s2521_s8  }
  0x25   :  { %2510 = dma.done.wait [#allocation3], 3072  }
  0x26   :  { %2511 = vsyncadd [#allocation3], 4294964224 }
  0x27   :  { %2512 = dma.done.wait [#allocation6], 2304  }
  0x28   :  { %2513 = vsyncadd [#allocation6], 4294964992  ;;  %v2523_v0 = vmov 0.0   ;;  %v85_v1 = vld [vmem:[#allocation2 + $0x8] sm:$0xff]  ;;  %v84_v2 = vld [vmem:[#allocation2] sm:$0xff]  ;;  %vm86_vm0 = vcmask 64512   ;;  %v218_v17 = vlaneseq }
  0x29   :  { %157 = vmatprep.mubr.f32.mxu1 %v2523_v0  ;;  %616 = vmatprep.mubr.f32.mxu0 %v2523_v0  ;;  %v82_v3 = vld [vmem:[%s3032_s0] sm:$0xff]  ;;  %v83_v4 = vld [vmem:[%s3032_s0 + $0x8] sm:$0xff]  ;;  %v2524_v5 = vmov 1   ;;  %v2525_v6 = vmov 2   ;;  %s2526_s17 = smov 124   ;;  %v2527_v11 = vmov 3  }
  0x2a   :  { %123 = vmatprep.subr.mxu1 %v85_v1  ;;  %2304 = vset.pattern.permute.xlu1 %v2524_v5  ;;  %v2528_v12 = vmov 0   ;;  %v2605_v20 = vshrl.u32 %v218_v17, 7  ;;  %v2621_v29 = vld [vmem:[%s3033_s1 + $0x8] sm:$0xff]  ;;  %v2626_v30 = vld [vmem:[%s3033_s1] sm:$0xff]  ;;  %vm234_vm5 = vcmask 130048   ;;  %s2529_s1 = smov 32  }
  0x2b   :  { %124 = vmatpush1.msra.mxu1 %v84_v2  ;;  %2305 = vset.pattern.permute.xlu0 %v2525_v6  ;;  %vm231_vm1 = vcmp.gt.f32.partialorder %v2621_v29, 0.0  ;;  %vm230_vm2 = vcmp.gt.f32.partialorder %v2626_v30, 0.0  ;;  %s2530_s21 = smov 64   ;;  %s2531_s22 = smov 96   ;;  %vm415_vm12 = vcmask 261120   ;;  %vm418_vm13 = vcmask 392192  }
  0x2c   :  { %2061 = vmatmul.mubr.msk.f32.vlgmr.msra.gmra.mxu1 %vm86_vm0, %v82_v3  ;;  %v2608_v22 = vsub.s32 1, %v2605_v20  ;;  %v2611_v23 = vsub.s32 2, %v2605_v20  ;;  %v2614_v25 = vsub.s32 3, %v2605_v20  ;;  %v2656_v1 = vsub.s32 0, %v2605_v20  ;;  %s2532_s23 = smov 48   ;;  %s2533_s24 = smov 86  }
  0x2d   :  { %163 = vmatprep.mubr.f32.mxu1 %v2523_v0  ;;  %vm441_vm14 = vcmask 523264  }
  0x30   :  { %2062 = vmatmul.mubr.msk.f32.gmra.mxu1 %vm86_vm0, %v83_v4 }
  0xec   :  { %v2593_v7 = vpop.f32.mrf.mxu1 }
  0xee   :  { %v161_v8 = vpop.f32.mrf.mxu1 }
  0xef   :  { %258 = vperm.xlu1 %2304, %v161_v8   ;;  %172 = vrot.lane.b32.xlu0 %v161_v8, %s2526_s17 }
  0xf0   :  { %v2596_v9 = vpop.f32.mrf.mxu1 }
  0xf2   :  { %v167_v10 = vpop.f32.mrf.mxu1 }
  0xf3   :  { %2306 = vset.pattern.permute.xlu1 %v2527_v11  ;;  %174 = vrot.lane.b32.xlu0 %v167_v10, %s2526_s17 }
  0xf4   :  { %346 = vperm.xlu1 %2306, %v161_v8  }
  0xf7   :  { %302 = vperm.xlu0 %2305, %v161_v8  }
  0xf8   :  { %2307 = vset.pattern.permute.xlu1 %v2524_v5 }
  0xf9   :  { %262 = vperm.xlu1 %2307, %v167_v10  }
  0xfb   :  { %2309 = vset.pattern.permute.xlu0 %v2528_v12 }
  0xfc   :  { %211 = vperm.xlu0 %2309, %v161_v8  }
  0xfd   :  { %2308 = vset.pattern.permute.xlu1 %v2525_v6 }
  0xfe   :  { %306 = vperm.xlu1 %2308, %v167_v10  }
 0x100   :  { %215 = vperm.xlu0 %2309, %v167_v10  }
 0x104   :  { %2310 = vset.pattern.permute.xlu0 %v2527_v11 }
 0x105   :  { %350 = vperm.xlu0 %2310, %v167_v10  }
 0x161   :  { %v173_v13 = vpop.permute.xlu0 %172 }
 0x162   :  { %178 = vxpose.xlu1.b32.start [1/2] (short) (narrow) %v173_v13, 8 }
 0x165   :  { %v175_v14 = vpop.permute.xlu0 %174 }
 0x166   :  { %179 = vxpose.xlu1.b32.end [2/2] (short) (narrow) %v175_v14, 8 }
 0x16a   :  { %v259_v15 = vpop.permute.xlu1 %258 }
 0x16f   :  { %v347_v16 = vpop.permute.xlu1 %346 }
 0x172   :  { %v303_v19 = vpop.permute.xlu0 %302 }
 0x174   :  { %v263_v18 = vpop.permute.xlu1 %262 }
 0x177   :  { %v212_v24 = vpop.permute.xlu0 %211 }
 0x179   :  { %v307_v21 = vpop.permute.xlu1 %306 }
 0x17b   :  { %v216_v36 = vpop.permute.xlu0 %215 }
 0x180   :  { %v351_v49 = vpop.permute.xlu0 %350 }
 0x184   :  { %2311 = vset.pattern.permute.xlu1 %v2524_v5 }
 0x1de   :  { %v194_v26 = vpop.trf.xlu1 }
 0x1df   :  { %v268_v27 = vrot.slane %v194_v26, %v2608_v22  ;;  %v312_v28 = vrot.slane %v194_v26, %v2611_v23  ;;  %v356_v31 = vrot.slane %v194_v26, %v2614_v25  ;;  %v221_v2 = vrot.slane %v194_v26, %v2656_v1 }
 0x1e1   :  { %v270_v32 = vadd.f32 %v268_v27, %v263_v18  ;;  %v269_v33 = vadd.f32 %v268_v27, %v259_v15  ;;  %v313_v34 = vadd.f32 %v312_v28, %v303_v19  ;;  %v314_v35 = vadd.f32 %v312_v28, %v307_v21 }
 0x1e2   :  { %v357_v43 = vadd.f32 %v356_v31, %v347_v16  ;;  %v358_v53 = vadd.f32 %v356_v31, %v351_v49  ;;  %v222_v3 = vadd.f32 %v221_v2, %v212_v24  ;;  %v223_v8 = vadd.f32 %v221_v2, %v216_v36 }
 0x1e3   :  { %vm272_vm3 = vcmp.gt.f32.partialorder %v270_v32, 0.0  ;;  %v274_v37 = vmul.f32 0.2, %v270_v32  ;;  %vm271_vm4 = vcmp.gt.f32.partialorder %v269_v33, 0.0  ;;  %v273_v38 = vmul.f32 0.2, %v269_v33 }
 0x1e4   :  { %vm315_vm6 = vcmp.gt.f32.partialorder %v313_v34, 0.0  ;;  %v317_v39 = vmul.f32 0.2, %v313_v34  ;;  %v318_v42 = vmul.f32 0.2, %v314_v35  ;;  %vm316_vm7 = vcmp.gt.f32.partialorder %v314_v35, 0.0 }
 0x1e5   :  { %v276_v40 = vsel %vm272_vm3, %v270_v32, %v274_v37  ;;  %v275_v41 = vsel %vm271_vm4, %v269_v33, %v273_v38  ;;  %v361_v52 = vmul.f32 0.2, %v357_v43  ;;  %vm359_vm8 = vcmp.gt.f32.partialorder %v357_v43, 0.0 }
 0x1e6   :  { %v278_v44 = vsel %vm231_vm1, %v276_v40, -1e+30  ;;  %v277_v45 = vsel %vm230_vm2, %v275_v41, -1e+30  ;;  %v319_v46 = vsel %vm315_vm6, %v313_v34, %v317_v39  ;;  %v320_v51 = vsel %vm316_vm7, %v314_v35, %v318_v42 }
 0x1e7   :  { %v282_v47 = vsel %vm234_vm5, %v278_v44, -inf  ;;  %v279_v48 = vsel %vm234_vm5, %v277_v45, -inf  ;;  %v321_v50 = vsel %vm230_vm2, %v319_v46, -1e+30  ;;  %v322_v55 = vsel %vm231_vm1, %v320_v51, -1e+30 }
 0x1e8   :  { %283 = vmax.xlane.f32.xlu1 %v282_v47  ;;  %280 = vmax.xlane.f32.xlu0 %v279_v48  ;;  %v323_v54 = vsel %vm234_vm5, %v321_v50, -inf  ;;  %v363_v56 = vsel %vm359_vm8, %v357_v43, %v361_v52  ;;  %v362_v57 = vmul.f32 0.2, %v358_v53  ;;  %vm360_vm9 = vcmp.gt.f32.partialorder %v358_v53, 0.0 }
 0x1e9   :  { %v326_v58 = vsel %vm234_vm5, %v322_v55, -inf  ;;  %v365_v59 = vsel %vm230_vm2, %v363_v56, -1e+30  ;;  %v226_v4 = vmul.f32 0.2, %v222_v3  ;;  %vm224_vm10 = vcmp.gt.f32.partialorder %v222_v3, 0.0 }
 0x1ea   :  { %v364_v60 = vsel %vm360_vm9, %v358_v53, %v362_v57  ;;  %v367_v61 = vsel %vm234_vm5, %v365_v59, -inf  ;;  %v227_v13 = vmul.f32 0.2, %v223_v8  ;;  %vm225_vm11 = vcmp.gt.f32.partialorder %v223_v8, 0.0 }
 0x1eb   :  { %v366_v62 = vsel %vm231_vm1, %v364_v60, -1e+30  ;;  %v228_v10 = vsel %vm224_vm10, %v222_v3, %v226_v4 }
 0x1ec   :  { %324 = vmax.xlane.f32.xlu0 %v323_v54  ;;  %v370_v63 = vsel %vm234_vm5, %v366_v62, -inf  ;;  %v2661_v14 = vsel %vm230_vm2, %v228_v10, -1e+30  ;;  %v229_v15 = vsel %vm225_vm11, %v223_v8, %v227_v13 }
 0x1ed   :  { %v235_v16 = vsel %vm234_vm5, %v2661_v14, -inf  ;;  %v2667_v17 = vsel %vm231_vm1, %v229_v15, -1e+30 }
 0x1ee   :  { %v238_v18 = vsel %vm234_vm5, %v2667_v17, -inf }
 0x1f0   :  { %327 = vmax.xlane.f32.xlu0 %v326_v58 }
 0x1f4   :  { %368 = vmax.xlane.f32.xlu0 %v367_v61 }
 0x1f8   :  { %371 = vmax.xlane.f32.xlu0 %v370_v63 }
 0x1f9   :  { %435 = vrot.lane.b32.xlu1 %v2593_v7, %s2529_s1 }
 0x1fd   :  { %431 = vrot.lane.b32.xlu1 %v2596_v9, %s2530_s21 }
 0x20e   :  { %437 = vrot.lane.b32.xlu0 %v2596_v9, %s2529_s1 }
 0x22d   :  { %236 = vmax.xlane.f32.xlu0 %v235_v16 }
 0x231   :  { %239 = vmax.xlane.f32.xlu0 %v238_v18 }
 0x247   :  { %429 = vrot.lane.b32.xlu0 %v2593_v7, %s2530_s21 }
 0x271   :  { %v284_v19 = vpop.xlane.xlu1 %283  ;;  %v281_v21 = vpop.xlane.xlu0 %280 }
 0x272   :  { %v286_v24 = vsub.f32 %v278_v44, %v284_v19  ;;  %v285_v26 = vsub.f32 %v277_v45, %v281_v21 }
 0x274   :  { %v287_v27 = vmul.f32 1.442695, %v285_v26  ;;  %v289_v28 = vmul.f32 1.442695, %v286_v24 }
 0x275   :  { %v325_v31 = vpop.xlane.xlu0 %324  ;;  %v436_v42 = vpop.permute.xlu1 %435 }
 0x276   :  { %v329_v32 = vsub.f32 %v321_v50, %v325_v31  ;;  %2325 = vpow2.f32 %v287_v27 }
 0x277   :  { %2327 = vpow2.f32 %v289_v28 }
 0x278   :  { %v331_v33 = vmul.f32 1.442695, %v329_v32 }
 0x279   :  { %v328_v34 = vpop.xlane.xlu0 %327  ;;  %v432_v48 = vpop.permute.xlu1 %431 }
 0x27a   :  { %v330_v35 = vsub.f32 %v322_v55, %v328_v34  ;;  %2329 = vpow2.f32 %v331_v33 }
 0x27c   :  { %v333_v36 = vmul.f32 1.442695, %v330_v35 }
 0x27d   :  { %v369_v37 = vpop.xlane.xlu0 %368 }
 0x27e   :  { %2331 = vpow2.f32 %v333_v36  ;;  %v373_v38 = vsub.f32 %v365_v59, %v369_v37 }
 0x280   :  { %v375_v39 = vmul.f32 1.442695, %v373_v38 }
 0x281   :  { %v372_v40 = vpop.xlane.xlu0 %371 }
 0x282   :  { %2333 = vpow2.f32 %v375_v39  ;;  %v374_v41 = vsub.f32 %v366_v62, %v372_v40 }
 0x283   :  { %v2326_v43 = vpop.eup %2325 }
 0x284   :  { %v377_v44 = vmul.f32 1.442695, %v374_v41  ;;  %v291_v46 = vsel %vm234_vm5, %v2326_v43, 0.0  ;;  %v2328_v47 = vpop.eup %2327 }
 0x285   :  { %v438_v45 = vpop.permute.xlu0 %437  ;;  %292 = vadd.xlane.f32.xlu0 %v291_v46  ;;  %v294_v49 = vsel %vm234_vm5, %v2328_v47, 0.0 }
 0x286   :  { %2335 = vpow2.f32 %v377_v44  ;;  %2149 = vmatprep.subr.mxu1 %v438_v45 }
 0x287   :  { %2150 = vmatpush3.msra.mxu1 %v438_v45  ;;  %v2330_v50 = vpop.eup %2329 }
 0x288   :  { %2151 = vmatprep.subr.mxu1 %v436_v42  ;;  %v335_v53 = vsel %vm234_vm5, %v2330_v50, 0.0 }
 0x289   :  { %2152 = vmatpush3.msra.mxu1 %v436_v42  ;;  %295 = vadd.xlane.f32.xlu0 %v294_v49 }
 0x28a   :  { %2153 = vmatprep.subr.mxu1 %v432_v48 }
 0x28b   :  { %v2332_v51 = vpop.eup %2331  ;;  %2154 = vmatpush3.msra.mxu1 %v432_v48 }
 0x28c   :  { %v338_v52 = vsel %vm234_vm5, %v2332_v51, 0.0 }
 0x28d   :  { %339 = vadd.xlane.f32.xlu1 %v338_v52  ;;  %336 = vadd.xlane.f32.xlu0 %v335_v53 }
 0x28f   :  { %v2334_v54 = vpop.eup %2333 }
 0x290   :  { %v379_v55 = vsel %vm234_vm5, %v2334_v54, 0.0 }
 0x291   :  { %380 = vadd.xlane.f32.xlu0 %v379_v55  ;;  %v545_v55 = vld [vmem:[#allocation2 + $0x78] sm:$0xff] }
 0x292   :  { %576 = vmatprep.subr.mxu0 %v545_v55 }
 0x293   :  { %v2336_v56 = vpop.eup %2335 }
 0x294   :  { %v382_v57 = vsel %vm234_vm5, %v2336_v56, 0.0 }
 0x295   :  { %383 = vadd.xlane.f32.xlu1 %v382_v57  ;;  %v543_v57 = vld [vmem:[#allocation2 + $0x68] sm:$0xff] }
 0x2a6   :  { %425 = vrot.lane.b32.xlu1 %v2596_v9, %s2531_s22 }
 0x2a7   :  { %423 = vrot.lane.b32.xlu0 %v2593_v7, %s2531_s22 }
 0x2b6   :  { %v237_v58 = vpop.xlane.xlu0 %236 }
 0x2b7   :  { %v241_v59 = vsub.f32 %v2661_v14, %v237_v58  ;;  %v542_v58 = vld [vmem:[#allocation2 + $0x60] sm:$0xff] }
 0x2b9   :  { %v243_v60 = vmul.f32 1.442695, %v241_v59  ;;  %v541_v59 = vld [vmem:[#allocation2 + $0x58] sm:$0xff] }
 0x2ba   :  { %v240_v61 = vpop.xlane.xlu0 %239 }
 0x2bb   :  { %2337 = vpow2.f32 %v243_v60  ;;  %v242_v62 = vsub.f32 %v2667_v17, %v240_v61  ;;  %v540_v60 = vld [vmem:[#allocation2 + $0x50] sm:$0xff]  ;;  %v539_v61 = vld [vmem:[#allocation2 + $0x48] sm:$0xff] }
 0x2bd   :  { %v245_v63 = vmul.f32 1.442695, %v242_v62  ;;  %v538_v62 = vld [vmem:[#allocation2 + $0x40] sm:$0xff] }
 0x2be   :  { %v430_v2 = vpop.permute.xlu0 %429 }
 0x2bf   :  { %2339 = vpow2.f32 %v245_v63  ;;  %2155 = vmatprep.subr.mxu1 %v430_v2  ;;  %v2706_v63 = vld [vmem:[#allocation5] sm:$0xff] }
 0x2c0   :  { %2156 = vmatpush3.msra.mxu1 %v430_v2  ;;  %v526_v2 = vrot.slane %v2706_v63, %v2656_v1 }
 0x2c8   :  { %v2338_v3 = vpop.eup %2337 }
 0x2c9   :  { %v247_v4 = vsel %vm234_vm5, %v2338_v3, 0.0 }
 0x2ca   :  { %248 = vadd.xlane.f32.xlu0 %v247_v4 }
 0x2cc   :  { %v2340_v8 = vpop.eup %2339 }
 0x2cd   :  { %v250_v10 = vsel %vm234_vm5, %v2340_v8, 0.0 }
 0x2ce   :  { %251 = vadd.xlane.f32.xlu1 %v250_v10  ;;  %v532_v10 = vrot.slane %v2706_v63, %v2608_v22 }
 0x30e   :  { %v293_v13 = vpop.xlane.xlu0 %292 }
 0x30f   :  { %2341 = vrcp.f32 %v293_v13 }
 0x312   :  { %v296_v14 = vpop.xlane.xlu0 %295 }
 0x313   :  { %2343 = vrcp.f32 %v296_v14 }
 0x316   :  { %v340_v15 = vpop.xlane.xlu1 %339  ;;  %v337_v16 = vpop.xlane.xlu0 %336 }
 0x317   :  { %2345 = vrcp.f32 %v340_v15 }
 0x318   :  { %2347 = vrcp.f32 %v337_v16 }
 0x31a   :  { %v381_v17 = vpop.xlane.xlu0 %380 }
 0x31b   :  { %2349 = vrcp.f32 %v381_v17 }
 0x31c   :  { %v2342_v18 = vpop.eup %2341 }
 0x31d   :  { %v299_v21 = vmul.f32 %v2342_v18, %v2326_v43 }
 0x31e   :  { %v384_v19 = vpop.xlane.xlu1 %383  ;;  %v424_v31 = vpop.permute.xlu0 %423 }
 0x31f   :  { %2351 = vrcp.f32 %v384_v19  ;;  %391 = vrot.lane.b32.xlu1 %v299_v21, %s2521_s8 }
 0x320   :  { %v2344_v24 = vpop.eup %2343 }
 0x321   :  { %v300_v27 = vmul.f32 %v2344_v24, %v2328_v47 }
 0x322   :  { %v426_v26 = vpop.permute.xlu1 %425 }
 0x323   :  { %2157 = vmatprep.subr.mxu1 %v426_v26  ;;  %393 = vrot.lane.b32.xlu0 %v300_v27, %s2521_s8 }
 0x324   :  { %v2346_v28 = vpop.eup %2345  ;;  %2158 = vmatpush3.msra.mxu1 %v426_v26 }
 0x325   :  { %v2348_v32 = vpop.eup %2347  ;;  %2159 = vmatprep.subr.mxu1 %v424_v31  ;;  %v344_v33 = vmul.f32 %v2346_v28, %v2332_v51 }
 0x326   :  { %2160 = vmatpush3.msra.mxu1 %v424_v31  ;;  %v343_v34 = vmul.f32 %v2348_v32, %v2330_v50 }
 0x327   :  { %2161 = vmatprep.subr.mxu1 %v2596_v9  ;;  %401 = vrot.lane.b32.xlu0 %v344_v33, %s2529_s1 }
 0x328   :  { %399 = vrot.lane.b32.xlu1 %v343_v34, %s2529_s1  ;;  %v2350_v35 = vpop.eup %2349  ;;  %2162 = vmatpush3.msra.mxu1 %v2596_v9 }
 0x329   :  { %2163 = vmatprep.subr.mxu1 %v2593_v7  ;;  %v387_v36 = vmul.f32 %v2350_v35, %v2334_v54 }
 0x32a   :  { %2164 = vmatpush3.msra.mxu1 %v2593_v7 }
 0x32c   :  { %v2352_v37 = vpop.eup %2351  ;;  %407 = vrot.lane.b32.xlu1 %v387_v36, %s2532_s23 }
 0x32d   :  { %v388_v38 = vmul.f32 %v2352_v37, %v2336_v56  ;;  %v544_v56 = vld [vmem:[#allocation2 + $0x70] sm:$0xff] }
 0x32e   :  { %577 = vmatpush1.msra.mxu0 %v544_v56 }
 0x32f   :  { %409 = vrot.lane.b32.xlu0 %v388_v38, %s2532_s23  ;;  %578 = vmatprep.subr.mxu0 %v543_v57 }
 0x330   :  { %579 = vmatpush1.msra.mxu0 %v542_v58 }
 0x331   :  { %580 = vmatprep.subr.mxu0 %v541_v59 }
 0x332   :  { %581 = vmatpush1.msra.mxu0 %v540_v60 }
 0x333   :  { %582 = vmatprep.subr.mxu0 %v539_v61 }
 0x334   :  { %583 = vmatpush1.msra.mxu0 %v538_v62 }
 0x353   :  { %v249_v39 = vpop.xlane.xlu0 %248 }
 0x354   :  { %2353 = vrcp.f32 %v249_v39 }
 0x357   :  { %v252_v40 = vpop.xlane.xlu1 %251 }
 0x358   :  { %2355 = vrcp.f32 %v252_v40 }
 0x361   :  { %v2354_v43 = vpop.eup %2353 }
 0x362   :  { %v255_v45 = vmul.f32 %v2354_v43, %v2338_v3 }
 0x365   :  { %v2356_v44 = vpop.eup %2355 }
 0x366   :  { %v256_v47 = vmul.f32 %v2356_v44, %v2340_v8 }
 0x391   :  { %v392_v41 = vpop.permute.xlu1 %391 }
 0x392   :  { %v413_v7 = vsel %vm234_vm5, %v255_v45, %v392_v41 }
 0x395   :  { %v394_v42 = vpop.permute.xlu0 %393 }
 0x396   :  { %v414_v51 = vsel %vm234_vm5, %v256_v47, %v394_v42 }
 0x399   :  { %v402_v46 = vpop.permute.xlu0 %401 }
 0x39a   :  { %v400_v9 = vpop.permute.xlu1 %399  ;;  %v417_v52 = vsel %vm415_vm12, %v414_v51, %v402_v46 }
 0x39b   :  { %v416_v48 = vsel %vm415_vm12, %v413_v7, %v400_v9 }
 0x39e   :  { %v408_v49 = vpop.permute.xlu1 %407 }
 0x39f   :  { %v419_v50 = vsel %vm418_vm13, %v416_v48, %v408_v49 }
 0x3a0   :  { %2165 = vmatprep.mubr.msk.f32.mxu1 %vm441_vm14, %v419_v50 }
 0x3a1   :  { %v410_v53 = vpop.permute.xlu0 %409 }
 0x3a2   :  { %v420_v54 = vsel %vm418_vm13, %v417_v52, %v410_v53 }
 0x3a3   :  { %2166 = vmatmul.mubr.msk.f32.vlgmr.msra.gmra.mxu1 %vm441_vm14, %v420_v54 }
 0x3a4   :  { %1069 = vmatprep.mubr.f32.mxu1 %v2523_v0 }
 0x463   :  { %v2167_v3 = vpop.f32.mrf.mxu1 }
 0x464   :  { %v528_v8 = vmul.f32 %v2167_v3, %v526_v2 }
 0x465   :  { %v514_v4 = vpop.f32.mrf.mxu1 }
 0x466   :  { %v527_v13 = vmul.f32 %v526_v2, %v514_v4  ;;  %v534_v15 = vadd.f32 %v532_v10, %v528_v8 }
 0x468   :  { %v533_v14 = vadd.f32 %v532_v10, %v527_v13  ;;  %v536_v17 = vmax.f32 %v534_v15, 0.0 }
 0x46a   :  { %v535_v16 = vmax.f32 %v533_v14, 0.0 }
 0x46c   :  { %2065 = vmatmul.mubr.msk.f32.vlgmr.msra.gmra.mxu0 %vm415_vm12, %v535_v16 }
 0x46d   :  { %622 = vmatprep.mubr.f32.mxu0 %v2523_v0 }
 0x470   :  { %2066 = vmatmul.mubr.msk.f32.gmra.mxu0 %vm415_vm12, %v536_v17 }
 0x52c   :  { %v2715_v18 = vpop.f32.mrf.mxu0 }
 0x52e   :  { %v620_v19 = vpop.f32.mrf.mxu0 }
 0x52f   :  { %631 = vrot.lane.b32.xlu1 %v620_v19, %s2526_s17 }
 0x530   :  { %v2718_v21 = vpop.f32.mrf.mxu0 }
 0x532   :  { %v626_v24 = vpop.f32.mrf.mxu0 }
 0x533   :  { %714 = vperm.xlu1 %2311, %v620_v19   ;;  %633 = vrot.lane.b32.xlu0 %v626_v24, %s2526_s17 }
 0x537   :  { %2312 = vset.pattern.permute.xlu1 %v2525_v6  ;;  %802 = vperm.xlu0 %2310, %v620_v19  }
 0x538   :  { %758 = vperm.xlu1 %2312, %v620_v19  }
 0x53b   :  { %2313 = vset.pattern.permute.xlu0 %v2524_v5 }
 0x53c   :  { %762 = vperm.xlu1 %2312, %v626_v24   ;;  %718 = vperm.xlu0 %2313, %v626_v24  }
 0x540   :  { %2314 = vset.pattern.permute.xlu1 %v2527_v11  ;;  %2315 = vset.pattern.permute.xlu0 %v2528_v12 }
 0x541   :  { %806 = vperm.xlu1 %2314, %v626_v24   ;;  %670 = vperm.xlu0 %2315, %v620_v19  }
 0x545   :  { %674 = vperm.xlu0 %2315, %v626_v24  }
 0x549   :  { %2316 = vset.pattern.permute.xlu0 %v2524_v5 }
 0x5a1   :  { %v632_v26 = vpop.permute.xlu1 %631 }
 0x5a2   :  { %637 = vxpose.xlu1.b32.start [1/2] (short) (narrow) %v632_v26, 8 }
 0x5a5   :  { %v634_v27 = vpop.permute.xlu0 %633 }
 0x5a6   :  { %638 = vxpose.xlu1.b32.end [2/2] (short) (narrow) %v634_v27, 8 }
 0x5ae   :  { %v715_v28 = vpop.permute.xlu1 %714 }
 0x5b2   :  { %v803_v33 = vpop.permute.xlu0 %802 }
 0x5b3   :  { %v759_v31 = vpop.permute.xlu1 %758 }
 0x5b7   :  { %v763_v32 = vpop.permute.xlu1 %762  ;;  %v719_v38 = vpop.permute.xlu0 %718 }
 0x5bc   :  { %v807_v34 = vpop.permute.xlu1 %806  ;;  %v671_v59 = vpop.permute.xlu0 %670 }
 0x5c0   :  { %v675_v8 = vpop.permute.xlu0 %674 }
 0x5c4   :  { %2317 = vset.pattern.permute.xlu1 %v2525_v6 }
 0x61e   :  { %v653_v35 = vpop.trf.xlu1 }
 0x61f   :  { %v724_v36 = vrot.slane %v653_v35, %v2608_v22  ;;  %v768_v37 = vrot.slane %v653_v35, %v2611_v23  ;;  %v812_v39 = vrot.slane %v653_v35, %v2614_v25  ;;  %v680_v55 = vrot.slane %v653_v35, %v2656_v1 }
 0x621   :  { %v725_v40 = vadd.f32 %v724_v36, %v715_v28  ;;  %v726_v41 = vadd.f32 %v724_v36, %v719_v38  ;;  %v769_v42 = vadd.f32 %v768_v37, %v759_v31  ;;  %v770_v43 = vadd.f32 %v768_v37, %v763_v32 }
 0x622   :  { %v813_v48 = vadd.f32 %v812_v39, %v803_v33  ;;  %v814_v58 = vadd.f32 %v812_v39, %v807_v34  ;;  %v681_v3 = vadd.f32 %v680_v55, %v671_v59  ;;  %v682_v15 = vadd.f32 %v680_v55, %v675_v8 }
 0x623   :  { %vm727_vm15 = vcmp.gt.f32.partialorder %v725_v40, 0.0  ;;  %v729_v9 = vmul.f32 0.2, %v725_v40  ;;  %vm728_vm0 = vcmp.gt.f32.partialorder %v726_v41, 0.0  ;;  %v730_v44 = vmul.f32 0.2, %v726_v41 }
 0x624   :  { %vm771_vm3 = vcmp.gt.f32.partialorder %v769_v42, 0.0  ;;  %v773_v45 = vmul.f32 0.2, %v769_v42  ;;  %v774_v47 = vmul.f32 0.2, %v770_v43  ;;  %vm772_vm4 = vcmp.gt.f32.partialorder %v770_v43, 0.0 }
 0x625   :  { %v731_v7 = vsel %vm727_vm15, %v725_v40, %v729_v9  ;;  %v732_v46 = vsel %vm728_vm0, %v726_v41, %v730_v44  ;;  %v817_v57 = vmul.f32 0.2, %v813_v48  ;;  %vm815_vm6 = vcmp.gt.f32.partialorder %v813_v48, 0.0 }
 0x626   :  { %v733_v49 = vsel %vm230_vm2, %v731_v7, -1e+30  ;;  %v734_v50 = vsel %vm231_vm1, %v732_v46, -1e+30  ;;  %v775_v51 = vsel %vm771_vm3, %v769_v42, %v773_v45  ;;  %v776_v56 = vsel %vm772_vm4, %v770_v43, %v774_v47 }
 0x627   :  { %v735_v52 = vsel %vm234_vm5, %v733_v49, -inf  ;;  %v738_v53 = vsel %vm234_vm5, %v734_v50, -inf  ;;  %v777_v54 = vsel %vm230_vm2, %v775_v51, -1e+30  ;;  %v778_v61 = vsel %vm231_vm1, %v776_v56, -1e+30 }
 0x628   :  { %736 = vmax.xlane.f32.xlu0 %v735_v52  ;;  %739 = vmax.xlane.f32.xlu1 %v738_v53  ;;  %v779_v60 = vsel %vm234_vm5, %v777_v54, -inf  ;;  %v819_v62 = vsel %vm815_vm6, %v813_v48, %v817_v57  ;;  %v818_v2 = vmul.f32 0.2, %v814_v58  ;;  %vm816_vm7 = vcmp.gt.f32.partialorder %v814_v58, 0.0 }
 0x629   :  { %v782_v4 = vsel %vm234_vm5, %v778_v61, -inf  ;;  %v821_v10 = vsel %vm230_vm2, %v819_v62, -1e+30  ;;  %v685_v14 = vmul.f32 0.2, %v681_v3  ;;  %vm683_vm8 = vcmp.gt.f32.partialorder %v681_v3, 0.0 }
 0x62a   :  { %v820_v13 = vsel %vm816_vm7, %v814_v58, %v818_v2  ;;  %v823_v16 = vsel %vm234_vm5, %v821_v10, -inf  ;;  %v686_v24 = vmul.f32 0.2, %v682_v15  ;;  %vm684_vm9 = vcmp.gt.f32.partialorder %v682_v15, 0.0 }
 0x62b   :  { %v822_v17 = vsel %vm231_vm1, %v820_v13, -1e+30  ;;  %v687_v19 = vsel %vm683_vm8, %v681_v3, %v685_v14 }
 0x62c   :  { %780 = vmax.xlane.f32.xlu0 %v779_v60  ;;  %v826_v26 = vsel %vm234_vm5, %v822_v17, -inf  ;;  %v2751_v27 = vsel %vm230_vm2, %v687_v19, -1e+30  ;;  %v688_v28 = vsel %vm684_vm9, %v682_v15, %v686_v24 }
 0x62d   :  { %v691_v31 = vsel %vm234_vm5, %v2751_v27, -inf  ;;  %v2759_v32 = vsel %vm231_vm1, %v688_v28, -1e+30 }
 0x62e   :  { %v694_v33 = vsel %vm234_vm5, %v2759_v32, -inf }
 0x630   :  { %783 = vmax.xlane.f32.xlu0 %v782_v4 }
 0x634   :  { %824 = vmax.xlane.f32.xlu0 %v823_v16 }
 0x638   :  { %827 = vmax.xlane.f32.xlu0 %v826_v26 }
 0x639   :  { %891 = vrot.lane.b32.xlu1 %v2718_v21, %s2529_s1 }
 0x63c   :  { %692 = vmax.xlane.f32.xlu0 %v691_v31 }
 0x63d   :  { %885 = vrot.lane.b32.xlu1 %v2718_v21, %s2530_s21 }
 0x640   :  { %695 = vmax.xlane.f32.xlu0 %v694_v33 }
 0x641   :  { %883 = vrot.lane.b32.xlu1 %v2715_v18, %s2530_s21 }
 0x656   :  { %889 = vrot.lane.b32.xlu0 %v2715_v18, %s2529_s1 }
 0x6b1   :  { %v740_v34 = vpop.xlane.xlu1 %739  ;;  %v737_v35 = vpop.xlane.xlu0 %736 }
 0x6b2   :  { %v742_v36 = vsub.f32 %v734_v50, %v740_v34  ;;  %v741_v37 = vsub.f32 %v733_v49, %v737_v35 }
 0x6b4   :  { %v743_v38 = vmul.f32 1.442695, %v741_v37  ;;  %v745_v39 = vmul.f32 1.442695, %v742_v36 }
 0x6b5   :  { %v892_v40 = vpop.permute.xlu1 %891  ;;  %v781_v41 = vpop.xlane.xlu0 %780 }
 0x6b6   :  { %v785_v42 = vsub.f32 %v777_v54, %v781_v41  ;;  %2168 = vmatprep.subr.mxu0 %v892_v40  ;;  %2357 = vpow2.f32 %v743_v38 }
 0x6b7   :  { %2169 = vmatpush3.msra.mxu0 %v892_v40  ;;  %2359 = vpow2.f32 %v745_v39 }
 0x6b8   :  { %v787_v43 = vmul.f32 1.442695, %v785_v42 }
 0x6b9   :  { %v784_v9 = vpop.xlane.xlu0 %783  ;;  %v886_v58 = vpop.permute.xlu1 %885 }
 0x6ba   :  { %v786_v44 = vsub.f32 %v778_v61, %v784_v9  ;;  %2361 = vpow2.f32 %v787_v43 }
 0x6bc   :  { %v789_v45 = vmul.f32 1.442695, %v786_v44 }
 0x6bd   :  { %v825_v7 = vpop.xlane.xlu0 %824  ;;  %v884_v3 = vpop.permute.xlu1 %883 }
 0x6be   :  { %v829_v46 = vsub.f32 %v821_v10, %v825_v7  ;;  %2363 = vpow2.f32 %v789_v45 }
 0x6c0   :  { %v831_v47 = vmul.f32 1.442695, %v829_v46 }
 0x6c1   :  { %v828_v48 = vpop.xlane.xlu0 %827 }
 0x6c2   :  { %2365 = vpow2.f32 %v831_v47  ;;  %v830_v49 = vsub.f32 %v822_v17, %v828_v48 }
 0x6c3   :  { %v2358_v50 = vpop.eup %2357 }
 0x6c4   :  { %v833_v51 = vmul.f32 1.442695, %v830_v49  ;;  %v747_v52 = vsel %vm234_vm5, %v2358_v50, 0.0  ;;  %v2360_v54 = vpop.eup %2359 }
 0x6c5   :  { %v693_v53 = vpop.xlane.xlu0 %692  ;;  %748 = vadd.xlane.f32.xlu0 %v747_v52  ;;  %v750_v55 = vsel %vm234_vm5, %v2360_v54, 0.0 }
 0x6c6   :  { %2367 = vpow2.f32 %v833_v51  ;;  %v697_v13 = vsub.f32 %v2751_v27, %v693_v53 }
 0x6c7   :  { %v2362_v57 = vpop.eup %2361 }
 0x6c8   :  { %v791_v59 = vsel %vm234_vm5, %v2362_v57, 0.0  ;;  %v699_v14 = vmul.f32 1.442695, %v697_v13  ;;  %v993_v13 = vld [vmem:[#allocation2 + $0x90] sm:$0xff] }
 0x6c9   :  { %v696_v56 = vpop.xlane.xlu0 %695  ;;  %751 = vadd.xlane.f32.xlu0 %v750_v55 }
 0x6ca   :  { %v698_v15 = vsub.f32 %v2759_v32, %v696_v56  ;;  %2369 = vpow2.f32 %v699_v14  ;;  %v992_v14 = vld [vmem:[#allocation2 + $0x88] sm:$0xff] }
 0x6cb   :  { %v2772_v61 = vpop.eup %2363 }
 0x6cc   :  { %v794_v4 = vsel %vm234_vm5, %v2772_v61, 0.0  ;;  %v701_v16 = vmul.f32 1.442695, %v698_v15  ;;  %v991_v15 = vld [vmem:[#allocation2 + $0x80] sm:$0xff] }
 0x6cd   :  { %v890_v60 = vpop.permute.xlu0 %889  ;;  %792 = vadd.xlane.f32.xlu0 %v791_v59 }
 0x6ce   :  { %2170 = vmatprep.subr.mxu0 %v890_v60  ;;  %2371 = vpow2.f32 %v701_v16  ;;  %v979_v16 = vrot.slane %v2706_v63, %v2611_v23 }
 0x6cf   :  { %v2366_v62 = vpop.eup %2365  ;;  %2171 = vmatpush3.msra.mxu0 %v890_v60 }
 0x6d0   :  { %2172 = vmatprep.subr.mxu0 %v886_v58  ;;  %v835_v2 = vsel %vm234_vm5, %v2366_v62, 0.0 }
 0x6d1   :  { %836 = vadd.xlane.f32.xlu1 %v835_v2  ;;  %2173 = vmatpush3.msra.mxu0 %v886_v58  ;;  %v998_v2 = vld [vmem:[#allocation2 + $0xb8] sm:$0xff] }
 0x6d2   :  { %795 = vadd.xlane.f32.xlu0 %v794_v4  ;;  %2174 = vmatprep.subr.mxu0 %v884_v3  ;;  %v996_v4 = vld [vmem:[#allocation2 + $0xa8] sm:$0xff] }
 0x6d3   :  { %v2368_v8 = vpop.eup %2367  ;;  %2175 = vmatpush3.msra.mxu0 %v884_v3  ;;  %1029 = vmatprep.subr.mxu1 %v998_v2  ;;  %v997_v3 = vld [vmem:[#allocation2 + $0xb0] sm:$0xff] }
 0x6d4   :  { %v838_v10 = vsel %vm234_vm5, %v2368_v8, 0.0  ;;  %1030 = vmatpush1.msra.mxu1 %v997_v3 }
 0x6d5   :  { %1031 = vmatprep.subr.mxu1 %v996_v4 }
 0x6d6   :  { %839 = vadd.xlane.f32.xlu0 %v838_v10  ;;  %v994_v10 = vld [vmem:[#allocation2 + $0x98] sm:$0xff] }
 0x6d7   :  { %v2370_v17 = vpop.eup %2369 }
 0x6d8   :  { %v703_v19 = vsel %vm234_vm5, %v2370_v17, 0.0 }
 0x6db   :  { %v2372_v24 = vpop.eup %2371 }
 0x6dc   :  { %v706_v26 = vsel %vm234_vm5, %v2372_v24, 0.0 }
 0x6e2   :  { %877 = vrot.lane.b32.xlu1 %v2715_v18, %s2531_s22 }
 0x6ec   :  { %879 = vrot.lane.b32.xlu0 %v2718_v21, %s2531_s22 }
 0x706   :  { %704 = vadd.xlane.f32.xlu1 %v703_v19 }
 0x70b   :  { %707 = vadd.xlane.f32.xlu0 %v706_v26  ;;  %v985_v26 = vrot.slane %v2706_v63, %v2614_v25 }
 0x74e   :  { %v749_v28 = vpop.xlane.xlu0 %748 }
 0x74f   :  { %2373 = vrcp.f32 %v749_v28 }
 0x752   :  { %v752_v31 = vpop.xlane.xlu0 %751 }
 0x753   :  { %2375 = vrcp.f32 %v752_v31 }
 0x756   :  { %v793_v33 = vpop.xlane.xlu0 %792 }
 0x757   :  { %2377 = vrcp.f32 %v793_v33 }
 0x75a   :  { %v837_v27 = vpop.xlane.xlu1 %836 }
 0x75b   :  { %2379 = vrcp.f32 %v837_v27  ;;  %v796_v32 = vpop.xlane.xlu0 %795 }
 0x75c   :  { %2381 = vrcp.f32 %v796_v32  ;;  %v2374_v34 = vpop.eup %2373 }
 0x75d   :  { %v755_v35 = vmul.f32 %v2374_v34, %v2358_v50 }
 0x75e   :  { %v878_v41 = vpop.permute.xlu1 %877 }
 0x75f   :  { %v840_v36 = vpop.xlane.xlu0 %839  ;;  %847 = vrot.lane.b32.xlu0 %v755_v35, %s2521_s8 }
 0x760   :  { %2383 = vrcp.f32 %v840_v36  ;;  %v2376_v37 = vpop.eup %2375 }
 0x761   :  { %v756_v38 = vmul.f32 %v2376_v37, %v2360_v54 }
 0x763   :  { %v880_v39 = vpop.permute.xlu0 %879  ;;  %849 = vrot.lane.b32.xlu1 %v756_v38, %s2521_s8 }
 0x764   :  { %2176 = vmatprep.subr.mxu0 %v880_v39  ;;  %v2378_v40 = vpop.eup %2377 }
 0x765   :  { %2177 = vmatpush3.msra.mxu0 %v880_v39  ;;  %v799_v42 = vmul.f32 %v2378_v40, %v2362_v57 }
 0x766   :  { %2178 = vmatprep.subr.mxu0 %v878_v41 }
 0x767   :  { %2179 = vmatpush3.msra.mxu0 %v878_v41  ;;  %855 = vrot.lane.b32.xlu0 %v799_v42, %s2529_s1 }
 0x768   :  { %v2380_v43 = vpop.eup %2379  ;;  %2180 = vmatprep.subr.mxu0 %v2718_v21 }
 0x769   :  { %v2382_v9 = vpop.eup %2381  ;;  %2181 = vmatpush3.msra.mxu0 %v2718_v21  ;;  %v843_v44 = vmul.f32 %v2380_v43, %v2366_v62 }
 0x76a   :  { %2182 = vmatprep.subr.mxu0 %v2715_v18  ;;  %v800_v45 = vmul.f32 %v2382_v9, %v2772_v61 }
 0x76b   :  { %2183 = vmatpush3.msra.mxu0 %v2715_v18  ;;  %863 = vrot.lane.b32.xlu0 %v843_v44, %s2532_s23 }
 0x76c   :  { %857 = vrot.lane.b32.xlu1 %v800_v45, %s2529_s1 }
 0x76d   :  { %v2384_v7 = vpop.eup %2383 }
 0x76e   :  { %v844_v46 = vmul.f32 %v2384_v7, %v2368_v8  ;;  %v995_v8 = vld [vmem:[#allocation2 + $0xa0] sm:$0xff] }
 0x76f   :  { %1032 = vmatpush1.msra.mxu1 %v995_v8 }
 0x770   :  { %865 = vrot.lane.b32.xlu1 %v844_v46, %s2532_s23  ;;  %1033 = vmatprep.subr.mxu1 %v994_v10 }
 0x771   :  { %1034 = vmatpush1.msra.mxu1 %v993_v13 }
 0x772   :  { %1035 = vmatprep.subr.mxu1 %v992_v14 }
 0x773   :  { %1036 = vmatpush1.msra.mxu1 %v991_v15 }
 0x78f   :  { %v705_v47 = vpop.xlane.xlu1 %704 }
 0x790   :  { %2385 = vrcp.f32 %v705_v47 }
 0x794   :  { %v708_v48 = vpop.xlane.xlu0 %707 }
 0x795   :  { %2387 = vrcp.f32 %v708_v48 }
 0x79d   :  { %v2386_v49 = vpop.eup %2385 }
 0x79e   :  { %v711_v52 = vmul.f32 %v2386_v49, %v2370_v17 }
 0x7a2   :  { %v2388_v53 = vpop.eup %2387 }
 0x7a3   :  { %v712_v57 = vmul.f32 %v2388_v53, %v2372_v24 }
 0x7d1   :  { %v848_v21 = vpop.permute.xlu0 %847 }
 0x7d2   :  { %v869_v18 = vsel %vm234_vm5, %v711_v52, %v848_v21 }
 0x7d5   :  { %v850_v50 = vpop.permute.xlu1 %849 }
 0x7d6   :  { %v870_v59 = vsel %vm234_vm5, %v712_v57, %v850_v50 }
 0x7d9   :  { %v856_v51 = vpop.permute.xlu0 %855 }
 0x7da   :  { %v871_v54 = vsel %vm415_vm12, %v869_v18, %v856_v51 }
 0x7dd   :  { %v864_v56 = vpop.permute.xlu0 %863 }
 0x7de   :  { %v858_v55 = vpop.permute.xlu1 %857  ;;  %v873_v58 = vsel %vm418_vm13, %v871_v54, %v864_v56 }
 0x7df   :  { %2184 = vmatprep.mubr.msk.f32.mxu0 %vm441_vm14, %v873_v58  ;;  %v872_v60 = vsel %vm415_vm12, %v870_v59, %v858_v55 }
 0x7e2   :  { %v866_v61 = vpop.permute.xlu1 %865 }
 0x7e3   :  { %v874_v62 = vsel %vm418_vm13, %v872_v60, %v866_v61 }
 0x7e4   :  { %2185 = vmatmul.mubr.msk.f32.vlgmr.msra.gmra.mxu0 %vm441_vm14, %v874_v62 }
 0x8a4   :  { %v2186_v17 = vpop.f32.mrf.mxu0 }
 0x8a5   :  { %v981_v24 = vmul.f32 %v2186_v17, %v979_v16 }
 0x8a6   :  { %v967_v19 = vpop.f32.mrf.mxu0 }
 0x8a7   :  { %v980_v28 = vmul.f32 %v979_v16, %v967_v19  ;;  %v987_v33 = vadd.f32 %v985_v26, %v981_v24 }
 0x8a9   :  { %v986_v31 = vadd.f32 %v985_v26, %v980_v28  ;;  %v989_v32 = vmax.f32 %v987_v33, 0.0 }
 0x8ab   :  { %v988_v27 = vmax.f32 %v986_v31, 0.0 }
 0x8ad   :  { %2069 = vmatmul.mubr.msk.f32.vlgmr.msra.gmra.mxu1 %vm415_vm12, %v988_v27 }
 0x8ae   :  { %1075 = vmatprep.mubr.f32.mxu1 %v2523_v0 }
 0x8b1   :  { %2070 = vmatmul.mubr.msk.f32.gmra.mxu1 %vm415_vm12, %v989_v32 }
 0x96d   :  { %v2812_v34 = vpop.f32.mrf.mxu1 }
 0x96f   :  { %v1073_v35 = vpop.f32.mrf.mxu1 }
 0x970   :  { %1211 = vperm.xlu1 %2317, %v1073_v35   ;;  %1084 = vrot.lane.b32.xlu0 %v1073_v35, %s2526_s17 }
 0x971   :  { %v2815_v36 = vpop.f32.mrf.mxu1 }
 0x973   :  { %v1079_v63 = vpop.f32.mrf.mxu1 }
 0x974   :  { %2318 = vset.pattern.permute.xlu1 %v2527_v11  ;;  %1167 = vperm.xlu0 %2316, %v1073_v35  }
 0x975   :  { %1255 = vperm.xlu1 %2318, %v1073_v35  }
 0x978   :  { %2321 = vset.pattern.permute.xlu0 %v2525_v6 }
 0x979   :  { %2319 = vset.pattern.permute.xlu1 %v2528_v12  ;;  %1215 = vperm.xlu0 %2321, %v1079_v63  }
 0x97a   :  { %1123 = vperm.xlu1 %2319, %v1073_v35  }
 0x97e   :  { %1086 = vrot.lane.b32.xlu1 %v1079_v63, %s2526_s17 }
 0x97f   :  { %2320 = vset.pattern.permute.xlu1 %v2524_v5 }
 0x982   :  { %1171 = vperm.xlu1 %2320, %v1079_v63  }
 0x986   :  { %2322 = vset.pattern.permute.xlu1 %v2527_v11 }
 0x987   :  { %1259 = vperm.xlu1 %2322, %v1079_v63  }
 0x98b   :  { %2323 = vset.pattern.permute.xlu1 %v2528_v12 }
 0x98c   :  { %1127 = vperm.xlu1 %2323, %v1079_v63  }
 0x9e2   :  { %v1085_v37 = vpop.permute.xlu0 %1084 }
 0x9e3   :  { %1090 = vxpose.xlu0.b32.start [1/2] (short) (narrow) %v1085_v37, 8 }
 0x9eb   :  { %v1212_v38 = vpop.permute.xlu1 %1211 }
 0x9ef   :  { %v1168_v41 = vpop.permute.xlu0 %1167 }
 0x9f0   :  { %v1256_v39 = vpop.permute.xlu1 %1255 }
 0x9f4   :  { %v1216_v42 = vpop.permute.xlu0 %1215 }
 0x9f5   :  { %v1124_v6 = vpop.permute.xlu1 %1123 }
 0x9f9   :  { %v1087_v40 = vpop.permute.xlu1 %1086 }
 0x9fa   :  { %1091 = vxpose.xlu0.b32.end [2/2] (short) (narrow) %v1087_v40, 8 }
 0x9fd   :  { %v1172_v5 = vpop.permute.xlu1 %1171 }
 0xa02   :  { %v1260_v58 = vpop.permute.xlu1 %1259 }
 0xa07   :  { %v1128_v26 = vpop.permute.xlu1 %1127 }
 0xa72   :  { %v1106_v43 = vpop.trf.xlu0 }
 0xa73   :  { %v1177_v9 = vrot.slane %v1106_v43, %v2608_v22  ;;  %v1221_v51 = vrot.slane %v1106_v43, %v2611_v23  ;;  %v1265_v53 = vrot.slane %v1106_v43, %v2614_v25  ;;  %v1133_v19 = vrot.slane %v1106_v43, %v2656_v1 }
 0xa75   :  { %v1179_v44 = vadd.f32 %v1177_v9, %v1172_v5  ;;  %v1178_v45 = vadd.f32 %v1177_v9, %v1168_v41  ;;  %v1222_v52 = vadd.f32 %v1221_v51, %v1212_v38  ;;  %v1223_v54 = vadd.f32 %v1221_v51, %v1216_v42 }
 0xa76   :  { %v1266_v57 = vadd.f32 %v1265_v53, %v1256_v39  ;;  %v1267_v62 = vadd.f32 %v1265_v53, %v1260_v58  ;;  %v1134_v24 = vadd.f32 %v1133_v19, %v1124_v6  ;;  %v1135_v31 = vadd.f32 %v1133_v19, %v1128_v26 }
 0xa77   :  { %vm1180_vm10 = vcmp.gt.f32.partialorder %v1178_v45, 0.0  ;;  %v1182_v7 = vmul.f32 0.2, %v1178_v45  ;;  %vm1181_vm11 = vcmp.gt.f32.partialorder %v1179_v44, 0.0  ;;  %v1183_v12 = vmul.f32 0.2, %v1179_v44 }
 0xa78   :  { %v1226_v18 = vmul.f32 0.2, %v1222_v52  ;;  %vm1224_vm15 = vcmp.gt.f32.partialorder %v1222_v52, 0.0  ;;  %v1227_v56 = vmul.f32 0.2, %v1223_v54  ;;  %vm1225_vm0 = vcmp.gt.f32.partialorder %v1223_v54, 0.0 }
 0xa79   :  { %v1184_v46 = vsel %vm1180_vm10, %v1178_v45, %v1182_v7  ;;  %v1185_v47 = vsel %vm1181_vm11, %v1179_v44, %v1183_v12  ;;  %v1270_v61 = vmul.f32 0.2, %v1266_v57  ;;  %vm1268_vm3 = vcmp.gt.f32.partialorder %v1266_v57, 0.0 }
 0xa7a   :  { %v2827_v48 = vsel %vm230_vm2, %v1184_v46, -1e+30  ;;  %v2831_v21 = vsel %vm231_vm1, %v1185_v47, -1e+30  ;;  %v1228_v55 = vsel %vm1224_vm15, %v1222_v52, %v1226_v18  ;;  %v1229_v60 = vsel %vm1225_vm0, %v1223_v54, %v1227_v56 }
 0xa7b   :  { %v1188_v49 = vsel %vm234_vm5, %v2827_v48, -inf  ;;  %v1191_v50 = vsel %vm234_vm5, %v2831_v21, -inf  ;;  %v1230_v59 = vsel %vm230_vm2, %v1228_v55, -1e+30  ;;  %v1231_v3 = vsel %vm231_vm1, %v1229_v60, -1e+30 }
 0xa7c   :  { %1189 = vmax.xlane.f32.xlu1 %v1188_v49  ;;  %1192 = vmax.xlane.f32.xlu0 %v1191_v50  ;;  %v1232_v2 = vsel %vm234_vm5, %v1230_v59, -inf  ;;  %v1272_v4 = vsel %vm1268_vm3, %v1266_v57, %v1270_v61  ;;  %v1271_v8 = vmul.f32 0.2, %v1267_v62  ;;  %vm1269_vm4 = vcmp.gt.f32.partialorder %v1267_v62, 0.0 }
 0xa7d   :  { %v1235_v10 = vsel %vm234_vm5, %v1231_v3, -inf  ;;  %v1274_v13 = vsel %vm230_vm2, %v1272_v4, -1e+30  ;;  %v1138_v28 = vmul.f32 0.2, %v1134_v24  ;;  %vm1136_vm6 = vcmp.gt.f32.partialorder %v1134_v24, 0.0 }
 0xa7e   :  { %v1273_v14 = vsel %vm1269_vm4, %v1267_v62, %v1271_v8  ;;  %v1276_v15 = vsel %vm234_vm5, %v1274_v13, -inf  ;;  %v1139_v27 = vmul.f32 0.2, %v1135_v31  ;;  %vm1137_vm7 = vcmp.gt.f32.partialorder %v1135_v31, 0.0 }
 0xa7f   :  { %v1275_v16 = vsel %vm231_vm1, %v1273_v14, -1e+30  ;;  %v1140_v33 = vsel %vm1136_vm6, %v1134_v24, %v1138_v28 }
 0xa80   :  { %v1279_v17 = vsel %vm234_vm5, %v1275_v16, -inf  ;;  %v2860_v32 = vsel %vm230_vm2, %v1140_v33, -1e+30  ;;  %v1141_v35 = vsel %vm1137_vm7, %v1135_v31, %v1139_v27  ;;  %vm1685_vm2 = vcmask 123904  }
 0xa81   :  { %v1144_v63 = vsel %vm234_vm5, %v2860_v32, -inf  ;;  %v2866_v37 = vsel %vm231_vm1, %v1141_v35, -1e+30 }
 0xa82   :  { %v1147_v38 = vsel %vm234_vm5, %v2866_v37, -inf }
 0xa8d   :  { %1344 = vrot.lane.b32.xlu1 %v2815_v36, %s2529_s1 }
 0xa92   :  { %1342 = vrot.lane.b32.xlu0 %v2812_v34, %s2529_s1 }
 0xab1   :  { %1233 = vmax.xlane.f32.xlu1 %v1232_v2 }
 0xab5   :  { %1236 = vmax.xlane.f32.xlu1 %v1235_v10 }
 0xab9   :  { %1277 = vmax.xlane.f32.xlu1 %v1276_v15 }
 0xabd   :  { %1280 = vmax.xlane.f32.xlu1 %v1279_v17 }
 0xace   :  { %1338 = vrot.lane.b32.xlu1 %v2815_v36, %s2530_s21 }
 0xaf2   :  { %1145 = vmax.xlane.f32.xlu1 %v1144_v63 }
 0xaf6   :  { %1148 = vmax.xlane.f32.xlu1 %v1147_v38 }
 0xb05   :  { %v1193_v39 = vpop.xlane.xlu0 %1192  ;;  %v1190_v6 = vpop.xlane.xlu1 %1189 }
 0xb06   :  { %v1194_v41 = vsub.f32 %v2827_v48, %v1190_v6  ;;  %v1195_v29 = vsub.f32 %v2831_v21, %v1193_v39 }
 0xb07   :  { %1336 = vrot.lane.b32.xlu1 %v2812_v34, %s2530_s21 }
 0xb08   :  { %v1196_v42 = vmul.f32 1.442695, %v1194_v41  ;;  %v1198_v43 = vmul.f32 1.442695, %v1195_v29 }
 0xb09   :  { %v1345_v30 = vpop.permute.xlu1 %1344  ;;  %v1343_v40 = vpop.permute.xlu0 %1342 }
 0xb0a   :  { %2187 = vmatprep.subr.mxu1 %v1345_v30  ;;  %2389 = vpow2.f32 %v1196_v42 }
 0xb0b   :  { %2188 = vmatpush3.msra.mxu1 %v1345_v30  ;;  %2391 = vpow2.f32 %v1198_v43 }
 0xb0c   :  { %2189 = vmatprep.subr.mxu1 %v1343_v40 }
 0xb0d   :  { %2190 = vmatpush3.msra.mxu1 %v1343_v40 }
 0xb17   :  { %v2390_v9 = vpop.eup %2389 }
 0xb18   :  { %v1200_v5 = vsel %vm234_vm5, %v2390_v9, 0.0  ;;  %v2392_v44 = vpop.eup %2391 }
 0xb19   :  { %v1203_v45 = vsel %vm234_vm5, %v2392_v44, 0.0 }
 0xb2b   :  { %1201 = vadd.xlane.f32.xlu1 %v1200_v5 }
 0xb2f   :  { %1204 = vadd.xlane.f32.xlu1 %v1203_v45 }
 0xb3a   :  { %v1234_v7 = vpop.xlane.xlu1 %1233 }
 0xb3b   :  { %v1238_v12 = vsub.f32 %v1230_v59, %v1234_v7 }
 0xb3d   :  { %v1240_v46 = vmul.f32 1.442695, %v1238_v12 }
 0xb3e   :  { %v1237_v47 = vpop.xlane.xlu1 %1236 }
 0xb3f   :  { %2393 = vpow2.f32 %v1240_v46  ;;  %v1239_v48 = vsub.f32 %v1231_v3, %v1237_v47 }
 0xb41   :  { %v1242_v49 = vmul.f32 1.442695, %v1239_v48 }
 0xb42   :  { %v1278_v21 = vpop.xlane.xlu1 %1277 }
 0xb43   :  { %2395 = vpow2.f32 %v1242_v49  ;;  %v1282_v50 = vsub.f32 %v1274_v13, %v1278_v21 }
 0xb45   :  { %v1284_v51 = vmul.f32 1.442695, %v1282_v50 }
 0xb46   :  { %v1281_v52 = vpop.xlane.xlu1 %1280 }
 0xb47   :  { %2397 = vpow2.f32 %v1284_v51  ;;  %v1283_v53 = vsub.f32 %v1275_v16, %v1281_v52 }
 0xb49   :  { %v1286_v18 = vmul.f32 1.442695, %v1283_v53 }
 0xb4a   :  { %v1339_v54 = vpop.permute.xlu1 %1338 }
 0xb4b   :  { %2399 = vpow2.f32 %v1286_v18  ;;  %2191 = vmatprep.subr.mxu1 %v1339_v54 }
 0xb4c   :  { %v2394_v55 = vpop.eup %2393  ;;  %2192 = vmatpush3.msra.mxu1 %v1339_v54 }
 0xb4d   :  { %v1244_v56 = vsel %vm234_vm5, %v2394_v55, 0.0 }
 0xb4e   :  { %1245 = vadd.xlane.f32.xlu1 %v1244_v56  ;;  %v2909_v56 = vld [vmem:[#allocation7 + $0x20] sm:$0xff] }
 0xb50   :  { %v2396_v57 = vpop.eup %2395 }
 0xb51   :  { %v1247_v58 = vsel %vm234_vm5, %v2396_v57, 0.0 }
 0xb52   :  { %1248 = vadd.xlane.f32.xlu0 %v1247_v58  ;;  %v2916_v58 = vld [vmem:[#allocation7 + $0x78] sm:$0xff] }
 0xb54   :  { %v2398_v59 = vpop.eup %2397 }
 0xb55   :  { %v1288_v60 = vsel %vm234_vm5, %v2398_v59, 0.0 }
 0xb56   :  { %1289 = vadd.xlane.f32.xlu1 %v1288_v60  ;;  %v2921_v60 = vld [vmem:[#allocation7] sm:$0xff] }
 0xb58   :  { %v2400_v61 = vpop.eup %2399 }
 0xb59   :  { %v1291_v62 = vsel %vm234_vm5, %v2400_v61, 0.0 }
 0xb5a   :  { %1292 = vadd.xlane.f32.xlu0 %v1291_v62  ;;  %v2929_v62 = vld [vmem:[#allocation7 + $0x48] sm:$0xff] }
 0xb67   :  { %1330 = vrot.lane.b32.xlu1 %v2812_v34, %s2531_s22 }
 0xb70   :  { %1332 = vrot.lane.b32.xlu0 %v2815_v36, %s2531_s22 }
 0xb7b   :  { %v1146_v2 = vpop.xlane.xlu1 %1145 }
 0xb7c   :  { %v1150_v3 = vsub.f32 %v2860_v32, %v1146_v2  ;;  %v2935_v2 = vld [vmem:[#allocation7 + $0x38] sm:$0xff] }
 0xb7e   :  { %v1152_v4 = vmul.f32 1.442695, %v1150_v3  ;;  %v2937_v3 = vld [vmem:[#allocation7 + $0x28] sm:$0xff] }
 0xb7f   :  { %v1149_v8 = vpop.xlane.xlu1 %1148 }
 0xb80   :  { %2401 = vpow2.f32 %v1152_v4  ;;  %v1151_v10 = vsub.f32 %v2866_v37, %v1149_v8  ;;  %v2941_v4 = vld [vmem:[#allocation7 + $0x18] sm:$0xff]  ;;  %v2943_v8 = vld [vmem:[#allocation7 + $0x8] sm:$0xff] }
 0xb82   :  { %v1154_v13 = vmul.f32 1.442695, %v1151_v10  ;;  %v1431_v10 = vsub.s32 4, %v2605_v20 }
 0xb83   :  { %v1337_v14 = vpop.permute.xlu1 %1336 }
 0xb84   :  { %2403 = vpow2.f32 %v1154_v13  ;;  %2193 = vmatprep.subr.mxu1 %v1337_v14  ;;  %v1437_v13 = vsub.s32 5, %v2605_v20 }
 0xb85   :  { %2194 = vmatpush3.msra.mxu1 %v1337_v14  ;;  %v2949_v14 = vld [vmem:[#allocation5] sm:$0xff] }
 0xb8d   :  { %v2402_v15 = vpop.eup %2401 }
 0xb8e   :  { %v1156_v16 = vsel %vm234_vm5, %v2402_v15, 0.0 }
 0xb8f   :  { %1157 = vadd.xlane.f32.xlu1 %v1156_v16  ;;  %v1438_v16 = vrot.slane %v2949_v14, %v1437_v13  ;;  %v69_v13 = vld [vmem:[#allocation5 + $0x8] sm:$0x1f] }
 0xb91   :  { %v2404_v17 = vpop.eup %2403 }
 0xb92   :  { %v1159_v19 = vsel %vm234_vm5, %v2404_v17, 0.0 }
 0xb93   :  { %1160 = vadd.xlane.f32.xlu0 %v1159_v19 }
 0xbb4   :  { %v1202_v24 = vpop.xlane.xlu1 %1201 }
 0xbb5   :  { %2405 = vrcp.f32 %v1202_v24 }
 0xbb8   :  { %v1205_v26 = vpop.xlane.xlu1 %1204 }
 0xbb9   :  { %2407 = vrcp.f32 %v1205_v26 }
 0xbc2   :  { %v2406_v28 = vpop.eup %2405 }
 0xbc3   :  { %v1208_v31 = vmul.f32 %v2406_v28, %v2390_v9 }
 0xbc5   :  { %1300 = vrot.lane.b32.xlu0 %v1208_v31, %s2521_s8 }
 0xbc6   :  { %v2408_v33 = vpop.eup %2407 }
 0xbc7   :  { %v1209_v27 = vmul.f32 %v2408_v33, %v2392_v44 }
 0xbc9   :  { %1302 = vrot.lane.b32.xlu1 %v1209_v27, %s2521_s8 }
 0xbd7   :  { %v1246_v32 = vpop.xlane.xlu1 %1245 }
 0xbd8   :  { %2409 = vrcp.f32 %v1246_v32 }
 0xbdb   :  { %v1249_v35 = vpop.xlane.xlu0 %1248 }
 0xbdc   :  { %2411 = vrcp.f32 %v1249_v35 }
 0xbdf   :  { %v1290_v63 = vpop.xlane.xlu1 %1289 }
 0xbe0   :  { %2413 = vrcp.f32 %v1290_v63 }
 0xbe3   :  { %v1293_v37 = vpop.xlane.xlu0 %1292  ;;  %v1331_v40 = vpop.permute.xlu1 %1330 }
 0xbe4   :  { %2415 = vrcp.f32 %v1293_v37 }
 0xbe5   :  { %v2410_v38 = vpop.eup %2409 }
 0xbe6   :  { %v1252_v39 = vmul.f32 %v2410_v38, %v2394_v55  ;;  %v2907_v55 = vld [vmem:[#allocation7 + $0x30] sm:$0xff] }
 0xbe7   :  { %v1333_v6 = vpop.permute.xlu0 %1332  ;;  %2206 = vmatprep.subr.mxu0 %v2907_v55 }
 0xbe8   :  { %2195 = vmatprep.subr.mxu1 %v1333_v6  ;;  %1308 = vrot.lane.b32.xlu0 %v1252_v39, %s2529_s1 }
 0xbe9   :  { %v2412_v30 = vpop.eup %2411  ;;  %2196 = vmatpush3.msra.mxu1 %v1333_v6  ;;  %2207 = vmatpush3.msra.mxu0 %v2907_v55 }
 0xbea   :  { %2197 = vmatprep.subr.mxu1 %v1331_v40  ;;  %v1253_v41 = vmul.f32 %v2412_v30, %v2396_v57  ;;  %v2913_v57 = vld [vmem:[#allocation7 + $0x10] sm:$0xff]  ;;  %2208 = vmatprep.subr.mxu0 %v2909_v56 }
 0xbeb   :  { %2198 = vmatpush3.msra.mxu1 %v1331_v40  ;;  %2209 = vmatpush3.msra.mxu0 %v2909_v56  ;;  %v1445_v40 = vsub.s32 6, %v2605_v20 }
 0xbec   :  { %1310 = vrot.lane.b32.xlu1 %v1253_v41, %s2529_s1  ;;  %2199 = vmatprep.subr.mxu1 %v2815_v36 }
 0xbed   :  { %v2414_v29 = vpop.eup %2413  ;;  %2200 = vmatpush3.msra.mxu1 %v2815_v36  ;;  %2210 = vmatprep.subr.mxu0 %v2913_v57  ;;  %v1446_v41 = vrot.slane %v2949_v14, %v1445_v40 }
 0xbee   :  { %2201 = vmatprep.subr.mxu1 %v2812_v34  ;;  %v1296_v42 = vmul.f32 %v2414_v29, %v2398_v59  ;;  %v2918_v59 = vld [vmem:[#allocation7 + $0x68] sm:$0xff]  ;;  %2211 = vmatpush3.msra.mxu0 %v2913_v57 }
 0xbef   :  { %2202 = vmatpush3.msra.mxu1 %v2812_v34  ;;  %2212 = vmatprep.subr.mxu0 %v2921_v60 }
 0xbf0   :  { %1316 = vrot.lane.b32.xlu0 %v1296_v42, %s2532_s23  ;;  %2236 = vmatprep.subr.mxu1 %v2523_v0 }
 0xbf1   :  { %v2416_v43 = vpop.eup %2415  ;;  %2213 = vmatpush3.msra.mxu0 %v2921_v60 }
 0xbf2   :  { %v1297_v9 = vmul.f32 %v2416_v43, %v2400_v61  ;;  %v2926_v61 = vld [vmem:[#allocation7 + $0x58] sm:$0xff] }
 0xbf4   :  { %1318 = vrot.lane.b32.xlu1 %v1297_v9, %s2532_s23  ;;  %1556 = vrot.lane.b32.xlu0 %v2916_v58, %s2533_s24 }
 0xbf8   :  { %1554 = vrot.lane.b32.xlu1 %v2918_v59, %s2533_s24  ;;  %1552 = vrot.lane.b32.xlu0 %v2926_v61, %s2533_s24 }
 0xbfc   :  { %1550 = vrot.lane.b32.xlu1 %v2929_v62, %s2533_s24  ;;  %1548 = vrot.lane.b32.xlu0 %v2935_v2, %s2533_s24 }
 0xc00   :  { %1546 = vrot.lane.b32.xlu1 %v2937_v3, %s2533_s24  ;;  %1544 = vrot.lane.b32.xlu0 %v2941_v4, %s2533_s24 }
 0xc04   :  { %1542 = vrot.lane.b32.xlu1 %v2943_v8, %s2533_s24 }
 0xc18   :  { %v1158_v5 = vpop.xlane.xlu1 %1157 }
 0xc19   :  { %2417 = vrcp.f32 %v1158_v5 }
 0xc1c   :  { %v1161_v44 = vpop.xlane.xlu0 %1160 }
 0xc1d   :  { %2419 = vrcp.f32 %v1161_v44 }
 0xc26   :  { %v2418_v7 = vpop.eup %2417 }
 0xc27   :  { %v1164_v46 = vmul.f32 %v2418_v7, %v2402_v15  ;;  %v1432_v15 = vrot.slane %v2949_v14, %v1431_v10 }
 0xc2a   :  { %v2420_v47 = vpop.eup %2419 }
 0xc2b   :  { %v1165_v50 = vmul.f32 %v2420_v47, %v2404_v17 }
 0xc37   :  { %v1301_v45 = vpop.permute.xlu0 %1300 }
 0xc38   :  { %v1322_v34 = vsel %vm234_vm5, %v1164_v46, %v1301_v45  ;;  %v1532_v45 = vsub.s32 7, %v2605_v20 }
 0xc3b   :  { %v1303_v36 = vpop.permute.xlu1 %1302 }
 0xc3c   :  { %v1323_v52 = vsel %vm234_vm5, %v1165_v50, %v1303_v36  ;;  %v1533_v36 = vrot.slane %v2949_v14, %v1532_v45  ;;  %v1862_v14 = vrot.slane %v69_v13, %v2656_v1 }
 0xc5a   :  { %v1309_v12 = vpop.permute.xlu0 %1308 }
 0xc5b   :  { %v1324_v48 = vsel %vm415_vm12, %v1322_v34, %v1309_v12  ;;  %v67_v34 = vld [vmem:[%s3034_s2] sm:$0x3]  ;;  %s2535_s2 = smov [#allocation8]  }
 0xc5c   :  { %vm1647_vm1 = vcmp.gt.f32.partialorder %v67_v34, 0.0  ;;  %s2051_s27 = sshll.u32 %s2535_s2, 4  ;;  %s2052_s27 = int_to_ptr.vmem [resolvable:$true] %s2051_s27 }
 0xc5d   :  { %s2490_s28 = scalar_lea.vmem %s2052_s27, 32  ;;  %p2495_p2 = scmp.lt.s32.totalorder %s2052_s27, %s2052_s27 }
 0xc5e   :  { %v1311_v49 = vpop.permute.xlu1 %1310  ;;  %p2491_p1 = scmp.ne.s32.totalorder %s2052_s27, %s2490_s28  ;;  %p2496_p3 = scmp.lt.s32.totalorder %s2490_s28, %s2490_s28 }
 0xc5f   :  { %v1325_v53 = vsel %vm415_vm12, %v1323_v52, %v1311_v49 }
 0xc60   :  { %p2497_p4 = por %p2496_p3, %p2495_p2 }
 0xc62   :  { %v1317_v21 = vpop.permute.xlu0 %1316  ;;  %p2498_p5 = pnand %p2497_p4, %p2491_p1 }
 0xc63   :  { %v1326_v51 = vsel %vm418_vm13, %v1324_v48, %v1317_v21 }
 0xc64   :  { %2203 = vmatprep.mubr.msk.f32.mxu1 %vm441_vm14, %v1326_v51 }
 0xc66   :  { %v1319_v18 = vpop.permute.xlu1 %1318  ;;  %v1557_v32 = vpop.permute.xlu0 %1556 }
 0xc67   :  { %v1327_v54 = vsel %vm418_vm13, %v1325_v53, %v1319_v18  ;;  %2217 = vmatprep.subr.mxu0 %v1557_v32  ;;  %vm2534_vm13 = vmmov 0  }
 0xc68   :  { %2204 = vmatmul.mubr.msk.f32.vlgmr.msra.gmra.mxu1 %vm441_vm14, %v1327_v54 }
 0xc69   :  { %2240 = vmatprep.mubr.msk.f32.mxu1 %vm2534_vm13, %v2523_v0 }
 0xc6a   :  { %v1555_v35 = vpop.permute.xlu1 %1554  ;;  %v1553_v63 = vpop.permute.xlu0 %1552 }
 0xc6e   :  { %v1551_v37 = vpop.permute.xlu1 %1550  ;;  %v1549_v38 = vpop.permute.xlu0 %1548 }
 0xc72   :  { %v1547_v39 = vpop.permute.xlu1 %1546  ;;  %v1545_v6 = vpop.permute.xlu0 %1544 }
 0xc76   :  { %v1543_v30 = vpop.permute.xlu1 %1542 }
 0xd28   :  { %v2205_v17 = vpop.f32.mrf.mxu1 }
 0xd29   :  { %v1434_v19 = vmul.f32 %v2205_v17, %v1432_v15 }
 0xd2a   :  { %v1420_v24 = vpop.f32.mrf.mxu1 }
 0xd2b   :  { %v1440_v26 = vadd.f32 %v1438_v16, %v1434_v19  ;;  %v1433_v28 = vmul.f32 %v1432_v15, %v1420_v24  ;;  %v1867_v15 = vrot.slane %v69_v13, %v2608_v22  ;;  %v1957_v22 = vrot.slane %v69_v13, %v1431_v10 }
 0xd2d   :  { %v1442_v31 = vmax.f32 %v1440_v26, 0.0  ;;  %v1439_v33 = vadd.f32 %v1438_v16, %v1433_v28  ;;  %v1946_v28 = vrot.slane %v69_v13, %v2611_v23 }
 0xd2f   :  { %v1441_v27 = vmax.f32 %v1439_v33, 0.0  ;;  %2237 = vmatpush3.msra.mxu1 %v1442_v31 }
 0xd30   :  { %2238 = vmatprep.subr.mxu1 %v2523_v0 }
 0xd31   :  { %2214 = vmatprep.mubr.msk.f32.mxu0 %vm415_vm12, %v1441_v27  ;;  %2239 = vmatpush3.msra.mxu1 %v1441_v27 }
 0xd32   :  { %2215 = vmatmul.mubr.msk.f32.vlgmr.msra.gmra.mxu0 %vm415_vm12, %v1442_v31  ;;  %2243 = vmatprep.subr.mxu1 %v2523_v0  ;;  %v1951_v31 = vrot.slane %v69_v13, %v2614_v25 }
 0xd33   :  { %2218 = vmatpush3.msra.mxu0 %v1557_v32 }
 0xd34   :  { %2219 = vmatprep.subr.mxu0 %v1555_v35 }
 0xd35   :  { %2220 = vmatpush3.msra.mxu0 %v1555_v35 }
 0xd36   :  { %2221 = vmatprep.subr.mxu0 %v1553_v63 }
 0xd37   :  { %2222 = vmatpush3.msra.mxu0 %v1553_v63 }
 0xd38   :  { %2223 = vmatprep.subr.mxu0 %v1551_v37 }
 0xd39   :  { %2224 = vmatpush3.msra.mxu0 %v1551_v37 }
 0xd3a   :  { %2225 = vmatprep.subr.mxu0 %v1549_v38 }
 0xd3b   :  { %2226 = vmatpush3.msra.mxu0 %v1549_v38 }
 0xd3c   :  { %2227 = vmatprep.subr.mxu0 %v1547_v39 }
 0xd3d   :  { %2228 = vmatpush3.msra.mxu0 %v1547_v39 }
 0xd3e   :  { %2229 = vmatprep.subr.mxu0 %v1545_v6 }
 0xd3f   :  { %2230 = vmatpush3.msra.mxu0 %v1545_v6 }
 0xd40   :  { %2231 = vmatprep.subr.mxu0 %v1543_v30 }
 0xd41   :  { %2232 = vmatpush3.msra.mxu0 %v1543_v30 }
 0xd42   :  { %2254 = vmatprep.subr.mxu0 %v2523_v0 }
 0xdf2   :  { %v2216_v29 = vpop.f32.mrf.mxu0 }
 0xdf3   :  { %v1525_v42 = vadd.f32 %v2216_v29, %v1446_v41 }
 0xdf4   :  { %v1519_v43 = vpop.f32.mrf.mxu0 }
 0xdf5   :  { %v1520_v9 = vadd.f32 %v1519_v43, %v1446_v41 }
 0xdf7   :  { %2421 = vtanh.f32 %v1520_v9 }
 0xdf8   :  { %2423 = vtanh.f32 %v1525_v42 }
 0xe04   :  { %v2422_v5 = vpop.eup %2421 }
 0xe05   :  { %v2424_v44 = vpop.eup %2423  ;;  %2233 = vmatprep.mubr.msk.f32.mxu0 %vm441_vm14, %v2422_v5 }
 0xe06   :  { %2234 = vmatmul.mubr.msk.f32.vlgmr.msra.gmra.mxu0 %vm441_vm14, %v2424_v44 }
 0xe07   :  { %2255 = vmatpush3.msra.mxu0 %v2916_v58  ;;  %2270 = vmatprep.mubr.msk.f32.mxu0 %vm2534_vm13, %v2523_v0 }
 0xe08   :  { %2256 = vmatprep.subr.mxu0 %v2523_v0 }
 0xe09   :  { %2257 = vmatpush3.msra.mxu0 %v2918_v59 }
 0xe0a   :  { %2258 = vmatprep.subr.mxu0 %v2523_v0 }
 0xe0b   :  { %2259 = vmatpush3.msra.mxu0 %v2926_v61 }
 0xe0c   :  { %2260 = vmatprep.subr.mxu0 %v2523_v0 }
 0xe0d   :  { %2261 = vmatpush3.msra.mxu0 %v2929_v62 }
 0xe0e   :  { %2262 = vmatprep.subr.mxu0 %v2523_v0 }
 0xe0f   :  { %2263 = vmatpush3.msra.mxu0 %v2935_v2 }
 0xe10   :  { %2264 = vmatprep.subr.mxu0 %v2523_v0 }
 0xe11   :  { %2265 = vmatpush3.msra.mxu0 %v2937_v3 }
 0xe12   :  { %2266 = vmatprep.subr.mxu0 %v2523_v0 }
 0xe13   :  { %2267 = vmatpush3.msra.mxu0 %v2941_v4 }
 0xe14   :  { %2268 = vmatprep.subr.mxu0 %v2523_v0 }
 0xe15   :  { %2269 = vmatpush3.msra.mxu0 %v2943_v8 }
 0xec6   :  { %v2235_v7 = vpop.f32.mrf.mxu0 }
 0xec7   :  { %v1644_v47 = vadd.f32 %v2235_v7, %v1533_v36 }
 0xec8   :  { %v1638_v12 = vpop.f32.mrf.mxu0 }
 0xec9   :  { %v1639_v46 = vadd.f32 %v1638_v12, %v1533_v36 }
 0xecb   :  { %1648 = vxpose.xlu0.b32.start [1/2] (short) (narrow) %v1639_v46, 8 }
 0xecf   :  { %1649 = vxpose.xlu0.b32.end [2/2] (short) (narrow) %v1644_v47, 8 }
 0xef8   :  { %2324 = vset.pattern.permute.xlu0 %v2527_v11 }
 0xf47   :  { %v1664_v48 = vpop.trf.xlu0 }
 0xf48   :  { %v1683_v49 = vrot.slane %v1664_v48, %v2656_v1 }
 0xf4a   :  { %v1684_v21 = vsel %vm1647_vm1, %v1683_v49, -1e+30 }
 0xf4b   :  { %v1686_v50 = vsel %vm1685_vm2, %v1684_v21, -inf }
 0xf4c   :  { %1687 = vmax.xlane.f32.xlu1 %v1686_v50 }
 0xf5d   :  { %1780 = vrot.lane.b32.xlu1 %v2907_v55, %s2530_s21 }
 0xf61   :  { %1778 = vrot.lane.b32.xlu1 %v2909_v56, %s2530_s21 }
 0xf65   :  { %1776 = vrot.lane.b32.xlu1 %v2913_v57, %s2530_s21 }
 0xf69   :  { %1774 = vrot.lane.b32.xlu1 %v2921_v60, %s2530_s21 }
 0xf6d   :  { %1958 = vrot.lane.b32.xlu1 %v2943_v8, %s2531_s22 }
 0xf71   :  { %1960 = vrot.lane.b32.xlu1 %v2941_v4, %s2531_s22 }
 0xf75   :  { %1962 = vrot.lane.b32.xlu1 %v2937_v3, %s2531_s22 }
 0xf79   :  { %1964 = vrot.lane.b32.xlu1 %v2935_v2, %s2531_s22 }
 0xfd5   :  { %v1688_v11 = vpop.xlane.xlu1 %1687 }
 0xfd6   :  { %v1689_v51 = vsub.f32 %v1684_v21, %v1688_v11 }
 0xfd8   :  { %v1690_v52 = vmul.f32 1.442695, %v1689_v51 }
 0xfd9   :  { %v1781_v54 = vpop.permute.xlu1 %1780 }
 0xfda   :  { %2425 = vpow2.f32 %v1690_v52 }
 0xfdd   :  { %v1779_v55 = vpop.permute.xlu1 %1778 }
 0xfe1   :  { %v1777_v56 = vpop.permute.xlu1 %1776 }
 0xfe5   :  { %v1775_v57 = vpop.permute.xlu1 %1774 }
 0xfe7   :  { %v2426_v53 = vpop.eup %2425 }
 0xfe8   :  { %2241 = vmatmul.mubr.msk.f32.vlgmr.msra.gmra.mxu1 %vm234_vm5, %v2426_v53  ;;  %v1765_v18 = vsel %vm1685_vm2, %v2426_v53, 0.0  ;;  %vm2043_vm5 = vcmask 74752  }
 0xfe9   :  { %1766 = vadd.xlane.f32.xlu0 %v1765_v18  ;;  %2251 = vmatprep.mubr.msk.f32.mxu1 %vm2534_vm13, %v2523_v0  ;;  %v1959_v2 = vpop.permute.xlu1 %1958 }
 0xfea   :  { %2244 = vmatpush3.msra.mxu1 %v1781_v54 }
 0xfeb   :  { %2245 = vmatprep.subr.mxu1 %v2523_v0 }
 0xfec   :  { %2246 = vmatpush3.msra.mxu1 %v1779_v55 }
 0xfed   :  { %2247 = vmatprep.subr.mxu1 %v2523_v0  ;;  %v1961_v3 = vpop.permute.xlu1 %1960 }
 0xfee   :  { %2248 = vmatpush3.msra.mxu1 %v1777_v56 }
 0xfef   :  { %2249 = vmatprep.subr.mxu1 %v2523_v0 }
 0xff0   :  { %2250 = vmatpush3.msra.mxu1 %v1775_v57 }
 0xff1   :  { %2273 = vmatprep.subr.mxu1 %v2523_v0  ;;  %v1963_v4 = vpop.permute.xlu1 %1962 }
 0xff5   :  { %v1965_v8 = vpop.permute.xlu1 %1964 }
0x1072   :  { %v1767_v58 = vpop.xlane.xlu0 %1766 }
0x1073   :  { %2427 = vrcp.f32 %v1767_v58 }
0x1080   :  { %v2428_v59 = vpop.eup %2427 }
0x10a8   :  { %v1761_v60 = vpop.f32.mrf.mxu1 }
0x10a9   :  { %v1769_v61 = vmul.f32 %v2428_v59, %v1761_v60 }
0x10aa   :  { %v2242_v62 = vpop.f32.mrf.mxu1 }
0x10ab   :  { %2252 = vmatmul.mubr.msk.f32.vlgmr.msra.gmra.mxu1 %vm415_vm12, %v1769_v61 }
0x10ac   :  { %2281 = vmatprep.mubr.msk.f32.mxu1 %vm2534_vm13, %v2523_v0  ;;  %2274 = vmatpush3.msra.mxu1 %v1965_v8 }
0x10ad   :  { %2275 = vmatprep.subr.mxu1 %v2523_v0 }
0x10ae   :  { %2276 = vmatpush3.msra.mxu1 %v1963_v4 }
0x10af   :  { %2277 = vmatprep.subr.mxu1 %v2523_v0 }
0x10b0   :  { %2278 = vmatpush3.msra.mxu1 %v1961_v3 }
0x10b1   :  { %2279 = vmatprep.subr.mxu1 %v2523_v0 }
0x10b2   :  { %2280 = vmatpush3.msra.mxu1 %v1959_v2 }
0x116b   :  { %v1855_v16 = vpop.f32.mrf.mxu1 }
0x116c   :  { %v1863_v17 = vmul.f32 %v1862_v14, %v1855_v16 }
0x116d   :  { %v2253_v19 = vpop.f32.mrf.mxu1 }
0x116e   :  { %v1868_v24 = vadd.f32 %v1867_v15, %v1863_v17 }
0x1170   :  { %v1869_v26 = vmax.f32 %v1868_v24, 0.0 }
0x1172   :  { %2271 = vmatmul.mubr.msk.f32.vlgmr.msra.gmra.mxu0 %vm441_vm14, %v1869_v26 }
0x1232   :  { %v1939_v33 = vpop.f32.mrf.mxu0 }
0x1233   :  { %v1947_v27 = vmul.f32 %v1946_v28, %v1939_v33 }
0x1234   :  { %v2272_v0 = vpop.f32.mrf.mxu0 }
0x1235   :  { %v1952_v32 = vadd.f32 %v1951_v31, %v1947_v27 }
0x1237   :  { %v1953_v35 = vmax.f32 %v1952_v32, 0.0 }
0x1239   :  { %2282 = vmatmul.mubr.msk.f32.vlgmr.msra.gmra.mxu1 %vm415_vm12, %v1953_v35 }
0x12f9   :  { %v2039_v1 = vpop.f32.mrf.mxu1 }
0x12fa   :  { %v2040_v63 = vadd.f32 %v2039_v1, %v1957_v22 }
0x12fb   :  { %v2283_v37 = vpop.f32.mrf.mxu1 }
0x12fc   :  { %2044 = vst.msk [vmem:[#allocation8] sm:$0x3] %vm2043_vm5, %v2040_v63 }
0x12fd   :  { %2501 = shalt.err (!%p2498_p5)
}
0x12fe   :  { %2054 = dma.vmem_to_hbm [thread:$0]  %s2052_s27, 32, %s3038_s6, [#allocation4]  }
0x12ff   :  { %2514 = dma.done.wait [#allocation4], 32  }
0x1300   :  { %2515 = vsyncadd [#allocation4], 4294967264 }
0x1301   :  { %2058 = vsyncpa [#allocation3], 1 }
0x1302   :  { %2059 = vsyncpa [#allocation6], 1 }
0x1303   :  { %2060 = vsyncpa [#allocation4], 1 }

</bundles_post_ra>
